<compile_context>
chip_gen: v6e
topology: v6e:2x2x1
jax: 0.10.0
libtpu: 0.0.40
codegen_flags: <defaults>
</compile_context>

<pallas_src>
import functools
import math

import jax
import jax.numpy as jnp
from jax.experimental import pallas as pl
from jax.experimental.pallas import tpu as pltpu


# ---------------------------------------------------------------------------
# In-kernel helpers
# ---------------------------------------------------------------------------
def _layernorm(x, gamma, beta, eps=1e-5):
    # x: (N, D) f32, gamma/beta: (1, D) f32
    mean = jnp.mean(x, axis=-1, keepdims=True)
    xc = x - mean
    var = jnp.mean(xc * xc, axis=-1, keepdims=True)
    inv = jax.lax.rsqrt(var + eps)
    return xc * inv * gamma + beta


# ---------------------------------------------------------------------------
# Fused kernel: all encoder layers (+ optional final LayerNorm) for one batch tile
# ---------------------------------------------------------------------------
def _encoder_stack_kernel(x_ref,
                          wqkv_ref, bqkv_ref, wo_ref, bo_ref,
                          w1_ref, b1_ref, w2_ref, b2_ref,
                          g1_ref, be1_ref, g2_ref, be2_ref,
                          gf_ref, bf_ref,
                          o_ref, *,
                          num_layers, d_model, nhead, seq_len, batch_tile,
                          has_final_norm, compute_dtype, approx_reciprocal):
    TB, S, D, H = batch_tile, seq_len, d_model, nhead
    dh = D // H
    scale = 1.0 / math.sqrt(dh)

    # residual stream kept in f32
    x2 = x_ref[...].astype(jnp.float32).reshape(TB * S, D)

    for l in range(num_layers):                               # static unroll over layers
        # ---- multi-head self-attention (q = k = v = x) ----------------------
        xc = x2.astype(compute_dtype)
        qkv = jnp.dot(xc, wqkv_ref[l], preferred_element_type=jnp.float32)
        qkv = (qkv + bqkv_ref[l]).astype(compute_dtype)       # (TB*S, 3D)
        qkv3 = qkv.reshape(TB, S, 3 * D)

        attn = jnp.zeros((TB * S, D), jnp.float32)
        for h in range(H):                                    # static unroll over heads
            qh = qkv3[:, :, h * dh:(h + 1) * dh]              # (TB, S, dh)
            kh = qkv3[:, :, D + h * dh:D + (h + 1) * dh]
            vh = qkv3[:, :, 2 * D + h * dh:2 * D + (h + 1) * dh]
            # batched (single batch dim) score / context matmuls
            s = jnp.einsum('bid,bjd->bij', qh, kh,
                           preferred_element_type=jnp.float32) * scale   # (TB,S,S)
            m = jnp.max(s, axis=-1, keepdims=True)
            e = jnp.exp(s - m)
            denom = jnp.sum(e, axis=-1, keepdims=True)
            p = e * pl.reciprocal(denom, approx=approx_reciprocal)
            ctx = jnp.einsum('bij,bjd->bid', p.astype(compute_dtype), vh,
                             preferred_element_type=jnp.float32)         # (TB,S,dh)
            # accumulate ctx_h @ Wo[h] directly -> no concat over heads
            attn = attn + jnp.dot(
                ctx.reshape(TB * S, dh).astype(compute_dtype),
                wo_ref[l, h],                                  # (dh, D), pre-transposed
                preferred_element_type=jnp.float32)
        attn = attn + bo_ref[l]

        # ---- residual + LayerNorm 1 (dropout = identity in eval mode) -------
        y = _layernorm(x2 + attn, g1_ref[l], be1_ref[l])

        # ---- feed-forward: relu(y @ W1 + b1) @ W2 + b2 ------------------------
        h1 = jnp.dot(y.astype(compute_dtype), w1_ref[l],
                     preferred_element_type=jnp.float32) + b1_ref[l]
        h1 = jnp.maximum(h1, 0.0)
        h2 = jnp.dot(h1.astype(compute_dtype), w2_ref[l],
                     preferred_element_type=jnp.float32) + b2_ref[l]

        # ---- residual + LayerNorm 2 ------------------------------------------
        x2 = _layernorm(y + h2, g2_ref[l], be2_ref[l])

    if has_final_norm:
        x2 = _layernorm(x2, gf_ref[...], bf_ref[...])

    o_ref[...] = x2.reshape(TB, S, D).astype(o_ref.dtype)


# ---------------------------------------------------------------------------
# Wrappers
# ---------------------------------------------------------------------------
def _rep_spec(arr):
    zeros = (0,) * arr.ndim
    return pl.BlockSpec(arr.shape, lambda b, _z=zeros: _z)


def _choose_batch_tile(batch, seq):
    """Largest divisor of `batch` s.t. rows per step are bounded and (for v7x)
    there are at least 2 grid steps to feed both TensorCores."""
    best = 1
    for d in range(1, batch + 1):
        if batch % d:
            continue
        if batch >= 2 and batch // d < 2:
            continue                       # keep >=2 parallel steps
        if d * seq > 1024:
            continue                       # bound per-step rows / VMEM
        best = max(best, d)
    return best


def _stack_layer_params(layer_params, nhead, compute_dtype):
    """Stack per-layer PyTorch-layout params and pre-transpose to `x @ W` layout."""
    d_model = layer_params[0][2].shape[0]
    dh = d_model // nhead
    wqkv = jnp.stack([p[0].T for p in layer_params]).astype(compute_dtype)   # (L,D,3D)
    bqkv = jnp.stack([p[1] for p in layer_params]).astype(jnp.float32)       # (L,1,3D)
    wo = jnp.stack([p[2].T.reshape(nhead, dh, d_model)
                    for p in layer_params]).astype(compute_dtype)            # (L,H,dh,D)
    bo = jnp.stack([p[3] for p in layer_params]).astype(jnp.float32)         # (L,1,D)
    w1 = jnp.stack([p[4].T for p in layer_params]).astype(compute_dtype)     # (L,D,dff)
    b1 = jnp.stack([p[5] for p in layer_params]).astype(jnp.float32)         # (L,1,dff)
    w2 = jnp.stack([p[6].T for p in layer_params]).astype(compute_dtype)     # (L,dff,D)
    b2 = jnp.stack([p[7] for p in layer_params]).astype(jnp.float32)         # (L,1,D)
    ln = [jnp.stack([p[i] for p in layer_params]).astype(jnp.float32)
          for i in range(8, 12)]                                             # 4x (L,1,D)
    return [wqkv, bqkv, wo, bo, w1, b1, w2, b2] + ln


def custom_transformer_encoder(src_sbd, layer_params, final_norm_params, *,
                               d_model, nhead,
                               compute_dtype=jnp.bfloat16,
                               approx_reciprocal=True):
    """src_sbd: (S, B, D) like PyTorch's nn.TransformerEncoder; returns (S, B, D)."""
    S, B, D = src_sbd.shape
    assert D == d_model and D % nhead == 0
    num_layers = len(layer_params)

    x = jnp.transpose(src_sbd, (1, 0, 2))                      # -> (B, S, D)

    stacked = _stack_layer_params(layer_params, nhead, compute_dtype)
    if final_norm_params is not None:
        gf = final_norm_params[0].reshape(1, D).astype(jnp.float32)
        bf = final_norm_params[1].reshape(1, D).astype(jnp.float32)
        has_final_norm = True
    else:
        gf = jnp.ones((1, D), jnp.float32)
        bf = jnp.zeros((1, D), jnp.float32)
        has_final_norm = False

    TB = _choose_batch_tile(B, S)
    nb = B // TB

    kern = functools.partial(
        _encoder_stack_kernel,
        num_layers=num_layers, d_model=D, nhead=nhead, seq_len=S,
        batch_tile=TB, has_final_norm=has_final_norm,
        compute_dtype=compute_dtype, approx_reciprocal=approx_reciprocal)

    consts = list(stacked) + [gf, bf]
    in_specs = ([pl.BlockSpec((TB, S, D), lambda b: (b, 0, 0))]
                + [_rep_spec(c) for c in consts])

    # raise the scoped VMEM limit explicitly (v5e default is only 16 MiB),
    # but keep it within the smallest physical VMEM (v7x: 64 MiB).
    param_bytes = sum(int(c.size) * c.dtype.itemsize for c in consts)
    tile_bytes = TB * S * D * 4
    vmem_limit = int(max(32 << 20,
                         min(64 << 20,
                             3 * param_bytes + 64 * tile_bytes + (8 << 20))))

    out = pl.pallas_call(
        kern,
        out_shape=jax.ShapeDtypeStruct((B, S, D), src_sbd.dtype),
        grid=(nb,),
        in_specs=in_specs,
        out_specs=pl.BlockSpec((TB, S, D), lambda b: (b, 0, 0)),
        compiler_params=pltpu.CompilerParams(
            dimension_semantics=("parallel",),
            vmem_limit_bytes=vmem_limit),
    )(x, *consts)

    return jnp.transpose(out, (1, 0, 2))                       # back to (S, B, D)


# ---------------------------------------------------------------------------
# Deterministic parameter construction (shapes follow nn.TransformerEncoderLayer)
# ---------------------------------------------------------------------------
def init_layer_params(key, d_model, dim_ff):
    keys = jax.random.split(key, 8)
    u = lambda k, shape, s: jax.random.uniform(k, shape, jnp.float32, -s, s)
    s_d = 1.0 / math.sqrt(d_model)
    s_f = 1.0 / math.sqrt(dim_ff)
    wqkv = u(keys[0], (3 * d_model, d_model), s_d)
    bqkv = u(keys[1], (1, 3 * d_model), s_d)
    wo = u(keys[2], (d_model, d_model), s_d)
    bo = u(keys[3], (1, d_model), s_d)
    w1 = u(keys[4], (dim_ff, d_model), s_d)
    b1 = u(keys[5], (1, dim_ff), s_d)
    w2 = u(keys[6], (d_model, dim_ff), s_f)
    b2 = u(keys[7], (1, d_model), s_f)
    g1 = jnp.ones((1, d_model), jnp.float32)
    be1 = jnp.zeros((1, d_model), jnp.float32)
    g2 = jnp.ones((1, d_model), jnp.float32)
    be2 = jnp.zeros((1, d_model), jnp.float32)
    return (wqkv, bqkv, wo, bo, w1, b1, w2, b2, g1, be1, g2, be2)


# ---------------------------------------------------------------------------
# Pure-JAX reference for correctness checking
# ---------------------------------------------------------------------------
def _ref_layer(x, params, d_model, nhead):
    (wqkv, bqkv, wo, bo, w1, b1, w2, b2, g1, be1, g2, be2) = params
    dh = d_model // nhead
    qkv = x @ wqkv.T + bqkv[0]
    q, k, v = jnp.split(qkv, 3, axis=-1)
    outs = []
    for h in range(nhead):
        sl = slice(h * dh, (h + 1) * dh)
        s = (q[:, :, sl] / math.sqrt(dh)) @ jnp.swapaxes(k[:, :, sl], -1, -2)
        p = jax.nn.softmax(s, axis=-1)
        outs.append(p @ v[:, :, sl])
    attn = jnp.concatenate(outs, axis=-1) @ wo.T + bo[0]

    def ln(z, g, b):
        m = z.mean(-1, keepdims=True)
        var = ((z - m) ** 2).mean(-1, keepdims=True)
        return (z - m) / jnp.sqrt(var + 1e-5) * g[0] + b[0]

    y = ln(x + attn, g1, be1)
    h1 = jax.nn.relu(y @ w1.T + b1[0])
    h2 = h1 @ w2.T + b2[0]
    return ln(y + h2, g2, be2)


# ---------------------------------------------------------------------------
if __name__ == "__main__":
    S, B, D = 8, 4, 32           # seq, batch, d_model
    NHEAD, DFF, NUM_LAYERS = 4, 64, 2

    root = jax.random.PRNGKey(0)
    k_src, *k_layers = jax.random.split(root, NUM_LAYERS + 1)

    src = jax.random.normal(k_src, (S, B, D), jnp.float32)
    layer_params = [init_layer_params(k, D, DFF) for k in k_layers]
    final_norm = (jnp.ones((1, D), jnp.float32), jnp.zeros((1, D), jnp.float32))

    # pure-JAX reference
    x_ref = jnp.transpose(src, (1, 0, 2))
    for p in layer_params:
        x_ref = _ref_layer(x_ref, p, D, NHEAD)
    m = x_ref.mean(-1, keepdims=True)
    v = ((x_ref - m) ** 2).mean(-1, keepdims=True)
    x_ref = (x_ref - m) / jnp.sqrt(v + 1e-5) * final_norm[0][0] + final_norm[1][0]
    ref = jnp.transpose(x_ref, (1, 0, 2))

    # exact-precision path (f32 matmuls, exact reciprocal) -> strict check
    out_f32 = custom_transformer_encoder(
        src, layer_params, final_norm, d_model=D, nhead=NHEAD,
        compute_dtype=jnp.float32, approx_reciprocal=False)
    out_f32 = jax.block_until_ready(out_f32)
    assert out_f32.shape == (S, B, D)
    err = float(jnp.max(jnp.abs(out_f32 - ref)))
    assert err < 1e-4, err

    # optimized path (bf16 matmuls + approx reciprocal) -> loose check
    out_bf16 = custom_transformer_encoder(
        src, layer_params, final_norm, d_model=D, nhead=NHEAD,
        compute_dtype=jnp.bfloat16, approx_reciprocal=True)
    out_bf16 = jax.block_until_ready(out_bf16)
    err_bf16 = float(jnp.max(jnp.abs(out_bf16 - ref)))
    assert err_bf16 < 0.2, err_bf16

    print("KERNEL_OK")
</pallas_src>

<mosaic_0001>
module attributes {stable_mosaic.version = 11 : i64} {
  func.func @_encoder_stack_kernel(%arg0: i32, %arg1: memref<2x8x32xf32, #tpu.memory_space<vmem>>, %arg2: memref<2x32x96xf32, #tpu.memory_space<vmem>>, %arg3: memref<2x1x96xf32, #tpu.memory_space<vmem>>, %arg4: memref<2x4x8x32xf32, #tpu.memory_space<vmem>>, %arg5: memref<2x1x32xf32, #tpu.memory_space<vmem>>, %arg6: memref<2x32x64xf32, #tpu.memory_space<vmem>>, %arg7: memref<2x1x64xf32, #tpu.memory_space<vmem>>, %arg8: memref<2x64x32xf32, #tpu.memory_space<vmem>>, %arg9: memref<2x1x32xf32, #tpu.memory_space<vmem>>, %arg10: memref<2x1x32xf32, #tpu.memory_space<vmem>>, %arg11: memref<2x1x32xf32, #tpu.memory_space<vmem>>, %arg12: memref<2x1x32xf32, #tpu.memory_space<vmem>>, %arg13: memref<2x1x32xf32, #tpu.memory_space<vmem>>, %arg14: memref<1x32xf32, #tpu.memory_space<vmem>>, %arg15: memref<1x32xf32, #tpu.memory_space<vmem>>, %arg16: memref<2x8x32xf32, #tpu.memory_space<vmem>>) attributes {dimension_semantics = [#tpu.dimension_semantics<parallel>], iteration_bounds = array<i64: 2>, scalar_prefetch = 0 : i64, scratch_operands = 0 : i64, tpu.core_type = #tpu.core_type<tc>, window_params = [{transform_indices = @transform_0, window_bounds = array<i64: 2, 8, 32>}, {pipeline_mode = #tpu.pipeline_mode<synchronous>, transform_indices = @transform_1, window_bounds = array<i64: 2, 32, 96>}, {pipeline_mode = #tpu.pipeline_mode<synchronous>, transform_indices = @transform_2, window_bounds = array<i64: 2, 1, 96>}, {pipeline_mode = #tpu.pipeline_mode<synchronous>, transform_indices = @transform_3, window_bounds = array<i64: 2, 4, 8, 32>}, {pipeline_mode = #tpu.pipeline_mode<synchronous>, transform_indices = @transform_4, window_bounds = array<i64: 2, 1, 32>}, {pipeline_mode = #tpu.pipeline_mode<synchronous>, transform_indices = @transform_5, window_bounds = array<i64: 2, 32, 64>}, {pipeline_mode = #tpu.pipeline_mode<synchronous>, transform_indices = @transform_6, window_bounds = array<i64: 2, 1, 64>}, {pipeline_mode = #tpu.pipeline_mode<synchronous>, transform_indices = @transform_7, window_bounds = array<i64: 2, 64, 32>}, {pipeline_mode = #tpu.pipeline_mode<synchronous>, transform_indices = @transform_8, window_bounds = array<i64: 2, 1, 32>}, {pipeline_mode = #tpu.pipeline_mode<synchronous>, transform_indices = @transform_9, window_bounds = array<i64: 2, 1, 32>}, {pipeline_mode = #tpu.pipeline_mode<synchronous>, transform_indices = @transform_10, window_bounds = array<i64: 2, 1, 32>}, {pipeline_mode = #tpu.pipeline_mode<synchronous>, transform_indices = @transform_11, window_bounds = array<i64: 2, 1, 32>}, {pipeline_mode = #tpu.pipeline_mode<synchronous>, transform_indices = @transform_12, window_bounds = array<i64: 2, 1, 32>}, {pipeline_mode = #tpu.pipeline_mode<synchronous>, transform_indices = @transform_13, window_bounds = array<i64: 1, 32>}, {pipeline_mode = #tpu.pipeline_mode<synchronous>, transform_indices = @transform_14, window_bounds = array<i64: 1, 32>}, {transform_indices = @transform_15, window_bounds = array<i64: 2, 8, 32>}]} {
    %c0 = arith.constant 0 : index
    %c0_0 = arith.constant 0 : index
    %c0_1 = arith.constant 0 : index
    %0 = vector.load %arg1[%c0, %c0_0, %c0_1] : memref<2x8x32xf32, #tpu.memory_space<vmem>>, vector<2x8x32xf32>
    %1 = vector.shape_cast %0 : vector<2x8x32xf32> to vector<16x32xf32>
    %c0_2 = arith.constant 0 : index
    %c0_3 = arith.constant 0 : index
    %c0_4 = arith.constant 0 : index
    %2 = vector.load %arg2[%c0_2, %c0_3, %c0_4] : memref<2x32x96xf32, #tpu.memory_space<vmem>>, vector<1x32x96xf32>
    %3 = vector.shape_cast %2 : vector<1x32x96xf32> to vector<32x96xf32>
    %cst = arith.constant dense<0.000000e+00> : vector<16x96xf32>
    %4 = tpu.matmul %1, %3, %cst {dimension_numbers = #tpu.dot_dimension_numbers<[1], [0], [0], [1], [0, 0, 1, 1], [], []>} : vector<16x32xf32>, vector<32x96xf32>, vector<16x96xf32> -> vector<16x96xf32>
    %c0_5 = arith.constant 0 : index
    %c0_6 = arith.constant 0 : index
    %c0_7 = arith.constant 0 : index
    %5 = vector.load %arg3[%c0_5, %c0_6, %c0_7] : memref<2x1x96xf32, #tpu.memory_space<vmem>>, vector<1x1x96xf32>
    %6 = vector.shape_cast %5 : vector<1x1x96xf32> to vector<1x96xf32>
    %7 = vector.broadcast %6 : vector<1x96xf32> to vector<16x96xf32>
    %8 = arith.addf %4, %7 : vector<16x96xf32>
    %9 = vector.shape_cast %8 : vector<16x96xf32> to vector<2x8x96xf32>
    %cst_8 = arith.constant 0.000000e+00 : f32
    %10 = vector.broadcast %cst_8 : f32 to vector<16x32xf32>
    %11 = vector.extract_strided_slice %9 {offsets = [0, 0, 0], sizes = [2, 8, 8], strides = [1, 1, 1]} : vector<2x8x96xf32> to vector<2x8x8xf32>
    %12 = vector.extract_strided_slice %9 {offsets = [0, 0, 32], sizes = [2, 8, 8], strides = [1, 1, 1]} : vector<2x8x96xf32> to vector<2x8x8xf32>
    %13 = vector.extract_strided_slice %9 {offsets = [0, 0, 64], sizes = [2, 8, 8], strides = [1, 1, 1]} : vector<2x8x96xf32> to vector<2x8x8xf32>
    "tpu.trace_start"() <{level = 10 : i32, message = "bid,bjd->bij"}> : () -> ()
    %cst_9 = arith.constant dense<0.000000e+00> : vector<2x8x8xf32>
    %14 = tpu.matmul %11, %12, %cst_9 {dimension_numbers = #tpu.dot_dimension_numbers<[2], [2], [1], [1], [0, 0, 0, 1, 1, 1], [0], [0]>} : vector<2x8x8xf32>, vector<2x8x8xf32>, vector<2x8x8xf32> -> vector<2x8x8xf32>
    "tpu.trace_stop"() : () -> ()
    %cst_10 = arith.constant 0.353553385 : f32
    %15 = vector.broadcast %cst_10 : f32 to vector<2x8x8xf32>
    %16 = arith.mulf %14, %15 : vector<2x8x8xf32>
    %cst_11 = arith.constant dense<0xFF800000> : vector<2x8xf32>
    %17 = vector.multi_reduction <maximumf>, %16, %cst_11 [2] : vector<2x8x8xf32> to vector<2x8xf32>
    %18 = vector.shape_cast %17 : vector<2x8xf32> to vector<2x8x1xf32>
    %19 = vector.broadcast %18 : vector<2x8x1xf32> to vector<2x8x8xf32>
    %20 = arith.subf %16, %19 : vector<2x8x8xf32>
    %21 = math.exp %20 : vector<2x8x8xf32>
    %cst_12 = arith.constant dense<0.000000e+00> : vector<2x8xf32>
    %22 = vector.multi_reduction <add>, %21, %cst_12 [2] : vector<2x8x8xf32> to vector<2x8xf32>
    %23 = vector.shape_cast %22 : vector<2x8xf32> to vector<2x8x1xf32>
    %24 = tpu.reciprocal %23 : vector<2x8x1xf32> -> vector<2x8x1xf32>
    %25 = vector.broadcast %24 : vector<2x8x1xf32> to vector<2x8x8xf32>
    %26 = arith.mulf %21, %25 : vector<2x8x8xf32>
    "tpu.trace_start"() <{level = 10 : i32, message = "bij,bjd->bid"}> : () -> ()
    %cst_13 = arith.constant dense<0.000000e+00> : vector<2x8x8xf32>
    %27 = tpu.matmul %26, %13, %cst_13 {dimension_numbers = #tpu.dot_dimension_numbers<[2], [1], [1], [2], [0, 0, 0, 1, 1, 2], [0], [0]>} : vector<2x8x8xf32>, vector<2x8x8xf32>, vector<2x8x8xf32> -> vector<2x8x8xf32>
    "tpu.trace_stop"() : () -> ()
    %28 = vector.shape_cast %27 : vector<2x8x8xf32> to vector<16x8xf32>
    %c0_14 = arith.constant 0 : index
    %c0_15 = arith.constant 0 : index
    %c0_16 = arith.constant 0 : index
    %c0_17 = arith.constant 0 : index
    %29 = vector.load %arg4[%c0_14, %c0_15, %c0_16, %c0_17] : memref<2x4x8x32xf32, #tpu.memory_space<vmem>>, vector<1x1x8x32xf32>
    %30 = vector.shape_cast %29 : vector<1x1x8x32xf32> to vector<8x32xf32>
    %cst_18 = arith.constant dense<0.000000e+00> : vector<16x32xf32>
    %31 = tpu.matmul %28, %30, %cst_18 {dimension_numbers = #tpu.dot_dimension_numbers<[1], [0], [0], [1], [0, 0, 1, 1], [], []>} : vector<16x8xf32>, vector<8x32xf32>, vector<16x32xf32> -> vector<16x32xf32>
    %32 = arith.addf %10, %31 : vector<16x32xf32>
    %33 = vector.extract_strided_slice %9 {offsets = [0, 0, 8], sizes = [2, 8, 8], strides = [1, 1, 1]} : vector<2x8x96xf32> to vector<2x8x8xf32>
    %34 = vector.extract_strided_slice %9 {offsets = [0, 0, 40], sizes = [2, 8, 8], strides = [1, 1, 1]} : vector<2x8x96xf32> to vector<2x8x8xf32>
    %35 = vector.extract_strided_slice %9 {offsets = [0, 0, 72], sizes = [2, 8, 8], strides = [1, 1, 1]} : vector<2x8x96xf32> to vector<2x8x8xf32>
    "tpu.trace_start"() <{level = 10 : i32, message = "bid,bjd->bij"}> : () -> ()
    %cst_19 = arith.constant dense<0.000000e+00> : vector<2x8x8xf32>
    %36 = tpu.matmul %33, %34, %cst_19 {dimension_numbers = #tpu.dot_dimension_numbers<[2], [2], [1], [1], [0, 0, 0, 1, 1, 1], [0], [0]>} : vector<2x8x8xf32>, vector<2x8x8xf32>, vector<2x8x8xf32> -> vector<2x8x8xf32>
    "tpu.trace_stop"() : () -> ()
    %cst_20 = arith.constant 0.353553385 : f32
    %37 = vector.broadcast %cst_20 : f32 to vector<2x8x8xf32>
    %38 = arith.mulf %36, %37 : vector<2x8x8xf32>
    %cst_21 = arith.constant dense<0xFF800000> : vector<2x8xf32>
    %39 = vector.multi_reduction <maximumf>, %38, %cst_21 [2] : vector<2x8x8xf32> to vector<2x8xf32>
    %40 = vector.shape_cast %39 : vector<2x8xf32> to vector<2x8x1xf32>
    %41 = vector.broadcast %40 : vector<2x8x1xf32> to vector<2x8x8xf32>
    %42 = arith.subf %38, %41 : vector<2x8x8xf32>
    %43 = math.exp %42 : vector<2x8x8xf32>
    %cst_22 = arith.constant dense<0.000000e+00> : vector<2x8xf32>
    %44 = vector.multi_reduction <add>, %43, %cst_22 [2] : vector<2x8x8xf32> to vector<2x8xf32>
    %45 = vector.shape_cast %44 : vector<2x8xf32> to vector<2x8x1xf32>
    %46 = tpu.reciprocal %45 : vector<2x8x1xf32> -> vector<2x8x1xf32>
    %47 = vector.broadcast %46 : vector<2x8x1xf32> to vector<2x8x8xf32>
    %48 = arith.mulf %43, %47 : vector<2x8x8xf32>
    "tpu.trace_start"() <{level = 10 : i32, message = "bij,bjd->bid"}> : () -> ()
    %cst_23 = arith.constant dense<0.000000e+00> : vector<2x8x8xf32>
    %49 = tpu.matmul %48, %35, %cst_23 {dimension_numbers = #tpu.dot_dimension_numbers<[2], [1], [1], [2], [0, 0, 0, 1, 1, 2], [0], [0]>} : vector<2x8x8xf32>, vector<2x8x8xf32>, vector<2x8x8xf32> -> vector<2x8x8xf32>
    "tpu.trace_stop"() : () -> ()
    %50 = vector.shape_cast %49 : vector<2x8x8xf32> to vector<16x8xf32>
    %c0_24 = arith.constant 0 : index
    %c1 = arith.constant 1 : index
    %c0_25 = arith.constant 0 : index
    %c0_26 = arith.constant 0 : index
    %51 = vector.load %arg4[%c0_24, %c1, %c0_25, %c0_26] : memref<2x4x8x32xf32, #tpu.memory_space<vmem>>, vector<1x1x8x32xf32>
    %52 = vector.shape_cast %51 : vector<1x1x8x32xf32> to vector<8x32xf32>
    %cst_27 = arith.constant dense<0.000000e+00> : vector<16x32xf32>
    %53 = tpu.matmul %50, %52, %cst_27 {dimension_numbers = #tpu.dot_dimension_numbers<[1], [0], [0], [1], [0, 0, 1, 1], [], []>} : vector<16x8xf32>, vector<8x32xf32>, vector<16x32xf32> -> vector<16x32xf32>
    %54 = arith.addf %32, %53 : vector<16x32xf32>
    %55 = vector.extract_strided_slice %9 {offsets = [0, 0, 16], sizes = [2, 8, 8], strides = [1, 1, 1]} : vector<2x8x96xf32> to vector<2x8x8xf32>
    %56 = vector.extract_strided_slice %9 {offsets = [0, 0, 48], sizes = [2, 8, 8], strides = [1, 1, 1]} : vector<2x8x96xf32> to vector<2x8x8xf32>
    %57 = vector.extract_strided_slice %9 {offsets = [0, 0, 80], sizes = [2, 8, 8], strides = [1, 1, 1]} : vector<2x8x96xf32> to vector<2x8x8xf32>
    "tpu.trace_start"() <{level = 10 : i32, message = "bid,bjd->bij"}> : () -> ()
    %cst_28 = arith.constant dense<0.000000e+00> : vector<2x8x8xf32>
    %58 = tpu.matmul %55, %56, %cst_28 {dimension_numbers = #tpu.dot_dimension_numbers<[2], [2], [1], [1], [0, 0, 0, 1, 1, 1], [0], [0]>} : vector<2x8x8xf32>, vector<2x8x8xf32>, vector<2x8x8xf32> -> vector<2x8x8xf32>
    "tpu.trace_stop"() : () -> ()
    %cst_29 = arith.constant 0.353553385 : f32
    %59 = vector.broadcast %cst_29 : f32 to vector<2x8x8xf32>
    %60 = arith.mulf %58, %59 : vector<2x8x8xf32>
    %cst_30 = arith.constant dense<0xFF800000> : vector<2x8xf32>
    %61 = vector.multi_reduction <maximumf>, %60, %cst_30 [2] : vector<2x8x8xf32> to vector<2x8xf32>
    %62 = vector.shape_cast %61 : vector<2x8xf32> to vector<2x8x1xf32>
    %63 = vector.broadcast %62 : vector<2x8x1xf32> to vector<2x8x8xf32>
    %64 = arith.subf %60, %63 : vector<2x8x8xf32>
    %65 = math.exp %64 : vector<2x8x8xf32>
    %cst_31 = arith.constant dense<0.000000e+00> : vector<2x8xf32>
    %66 = vector.multi_reduction <add>, %65, %cst_31 [2] : vector<2x8x8xf32> to vector<2x8xf32>
    %67 = vector.shape_cast %66 : vector<2x8xf32> to vector<2x8x1xf32>
    %68 = tpu.reciprocal %67 : vector<2x8x1xf32> -> vector<2x8x1xf32>
    %69 = vector.broadcast %68 : vector<2x8x1xf32> to vector<2x8x8xf32>
    %70 = arith.mulf %65, %69 : vector<2x8x8xf32>
    "tpu.trace_start"() <{level = 10 : i32, message = "bij,bjd->bid"}> : () -> ()
    %cst_32 = arith.constant dense<0.000000e+00> : vector<2x8x8xf32>
    %71 = tpu.matmul %70, %57, %cst_32 {dimension_numbers = #tpu.dot_dimension_numbers<[2], [1], [1], [2], [0, 0, 0, 1, 1, 2], [0], [0]>} : vector<2x8x8xf32>, vector<2x8x8xf32>, vector<2x8x8xf32> -> vector<2x8x8xf32>
    "tpu.trace_stop"() : () -> ()
    %72 = vector.shape_cast %71 : vector<2x8x8xf32> to vector<16x8xf32>
    %c0_33 = arith.constant 0 : index
    %c2 = arith.constant 2 : index
    %c0_34 = arith.constant 0 : index
    %c0_35 = arith.constant 0 : index
    %73 = vector.load %arg4[%c0_33, %c2, %c0_34, %c0_35] : memref<2x4x8x32xf32, #tpu.memory_space<vmem>>, vector<1x1x8x32xf32>
    %74 = vector.shape_cast %73 : vector<1x1x8x32xf32> to vector<8x32xf32>
    %cst_36 = arith.constant dense<0.000000e+00> : vector<16x32xf32>
    %75 = tpu.matmul %72, %74, %cst_36 {dimension_numbers = #tpu.dot_dimension_numbers<[1], [0], [0], [1], [0, 0, 1, 1], [], []>} : vector<16x8xf32>, vector<8x32xf32>, vector<16x32xf32> -> vector<16x32xf32>
    %76 = arith.addf %54, %75 : vector<16x32xf32>
    %77 = vector.extract_strided_slice %9 {offsets = [0, 0, 24], sizes = [2, 8, 8], strides = [1, 1, 1]} : vector<2x8x96xf32> to vector<2x8x8xf32>
    %78 = vector.extract_strided_slice %9 {offsets = [0, 0, 56], sizes = [2, 8, 8], strides = [1, 1, 1]} : vector<2x8x96xf32> to vector<2x8x8xf32>
    %79 = vector.extract_strided_slice %9 {offsets = [0, 0, 88], sizes = [2, 8, 8], strides = [1, 1, 1]} : vector<2x8x96xf32> to vector<2x8x8xf32>
    "tpu.trace_start"() <{level = 10 : i32, message = "bid,bjd->bij"}> : () -> ()
    %cst_37 = arith.constant dense<0.000000e+00> : vector<2x8x8xf32>
    %80 = tpu.matmul %77, %78, %cst_37 {dimension_numbers = #tpu.dot_dimension_numbers<[2], [2], [1], [1], [0, 0, 0, 1, 1, 1], [0], [0]>} : vector<2x8x8xf32>, vector<2x8x8xf32>, vector<2x8x8xf32> -> vector<2x8x8xf32>
    "tpu.trace_stop"() : () -> ()
    %cst_38 = arith.constant 0.353553385 : f32
    %81 = vector.broadcast %cst_38 : f32 to vector<2x8x8xf32>
    %82 = arith.mulf %80, %81 : vector<2x8x8xf32>
    %cst_39 = arith.constant dense<0xFF800000> : vector<2x8xf32>
    %83 = vector.multi_reduction <maximumf>, %82, %cst_39 [2] : vector<2x8x8xf32> to vector<2x8xf32>
    %84 = vector.shape_cast %83 : vector<2x8xf32> to vector<2x8x1xf32>
    %85 = vector.broadcast %84 : vector<2x8x1xf32> to vector<2x8x8xf32>
    %86 = arith.subf %82, %85 : vector<2x8x8xf32>
    %87 = math.exp %86 : vector<2x8x8xf32>
    %cst_40 = arith.constant dense<0.000000e+00> : vector<2x8xf32>
    %88 = vector.multi_reduction <add>, %87, %cst_40 [2] : vector<2x8x8xf32> to vector<2x8xf32>
    %89 = vector.shape_cast %88 : vector<2x8xf32> to vector<2x8x1xf32>
    %90 = tpu.reciprocal %89 : vector<2x8x1xf32> -> vector<2x8x1xf32>
    %91 = vector.broadcast %90 : vector<2x8x1xf32> to vector<2x8x8xf32>
    %92 = arith.mulf %87, %91 : vector<2x8x8xf32>
    "tpu.trace_start"() <{level = 10 : i32, message = "bij,bjd->bid"}> : () -> ()
    %cst_41 = arith.constant dense<0.000000e+00> : vector<2x8x8xf32>
    %93 = tpu.matmul %92, %79, %cst_41 {dimension_numbers = #tpu.dot_dimension_numbers<[2], [1], [1], [2], [0, 0, 0, 1, 1, 2], [0], [0]>} : vector<2x8x8xf32>, vector<2x8x8xf32>, vector<2x8x8xf32> -> vector<2x8x8xf32>
    "tpu.trace_stop"() : () -> ()
    %94 = vector.shape_cast %93 : vector<2x8x8xf32> to vector<16x8xf32>
    %c0_42 = arith.constant 0 : index
    %c3 = arith.constant 3 : index
    %c0_43 = arith.constant 0 : index
    %c0_44 = arith.constant 0 : index
    %95 = vector.load %arg4[%c0_42, %c3, %c0_43, %c0_44] : memref<2x4x8x32xf32, #tpu.memory_space<vmem>>, vector<1x1x8x32xf32>
    %96 = vector.shape_cast %95 : vector<1x1x8x32xf32> to vector<8x32xf32>
    %cst_45 = arith.constant dense<0.000000e+00> : vector<16x32xf32>
    %97 = tpu.matmul %94, %96, %cst_45 {dimension_numbers = #tpu.dot_dimension_numbers<[1], [0], [0], [1], [0, 0, 1, 1], [], []>} : vector<16x8xf32>, vector<8x32xf32>, vector<16x32xf32> -> vector<16x32xf32>
    %98 = arith.addf %76, %97 : vector<16x32xf32>
    %c0_46 = arith.constant 0 : index
    %c0_47 = arith.constant 0 : index
    %c0_48 = arith.constant 0 : index
    %99 = vector.load %arg5[%c0_46, %c0_47, %c0_48] : memref<2x1x32xf32, #tpu.memory_space<vmem>>, vector<1x1x32xf32>
    %100 = vector.shape_cast %99 : vector<1x1x32xf32> to vector<1x32xf32>
    %101 = vector.broadcast %100 : vector<1x32xf32> to vector<16x32xf32>
    %102 = arith.addf %98, %101 : vector<16x32xf32>
    %103 = arith.addf %1, %102 : vector<16x32xf32>
    %c0_49 = arith.constant 0 : index
    %c0_50 = arith.constant 0 : index
    %c0_51 = arith.constant 0 : index
    %104 = vector.load %arg10[%c0_49, %c0_50, %c0_51] : memref<2x1x32xf32, #tpu.memory_space<vmem>>, vector<1x1x32xf32>
    %105 = vector.shape_cast %104 : vector<1x1x32xf32> to vector<1x32xf32>
    %c0_52 = arith.constant 0 : index
    %c0_53 = arith.constant 0 : index
    %c0_54 = arith.constant 0 : index
    %106 = vector.load %arg11[%c0_52, %c0_53, %c0_54] : memref<2x1x32xf32, #tpu.memory_space<vmem>>, vector<1x1x32xf32>
    %107 = vector.shape_cast %106 : vector<1x1x32xf32> to vector<1x32xf32>
    %cst_55 = arith.constant dense<0.000000e+00> : vector<16xf32>
    %108 = vector.multi_reduction <add>, %103, %cst_55 [1] : vector<16x32xf32> to vector<16xf32>
    %109 = vector.shape_cast %108 : vector<16xf32> to vector<16x1xf32>
    %cst_56 = arith.constant 3.200000e+01 : f32
    %110 = vector.broadcast %cst_56 : f32 to vector<16x1xf32>
    %111 = arith.divf %109, %110 : vector<16x1xf32>
    %112 = vector.broadcast %111 : vector<16x1xf32> to vector<16x32xf32>
    %113 = arith.subf %103, %112 : vector<16x32xf32>
    %114 = arith.mulf %113, %113 : vector<16x32xf32>
    %cst_57 = arith.constant dense<0.000000e+00> : vector<16xf32>
    %115 = vector.multi_reduction <add>, %114, %cst_57 [1] : vector<16x32xf32> to vector<16xf32>
    %116 = vector.shape_cast %115 : vector<16xf32> to vector<16x1xf32>
    %cst_58 = arith.constant 3.200000e+01 : f32
    %117 = vector.broadcast %cst_58 : f32 to vector<16x1xf32>
    %118 = arith.divf %116, %117 : vector<16x1xf32>
    %cst_59 = arith.constant 9.99999974E-6 : f32
    %119 = vector.broadcast %cst_59 : f32 to vector<16x1xf32>
    %120 = arith.addf %118, %119 : vector<16x1xf32>
    %121 = math.rsqrt %120 : vector<16x1xf32>
    %122 = vector.broadcast %121 : vector<16x1xf32> to vector<16x32xf32>
    %123 = arith.mulf %113, %122 : vector<16x32xf32>
    %124 = vector.broadcast %105 : vector<1x32xf32> to vector<16x32xf32>
    %125 = arith.mulf %123, %124 : vector<16x32xf32>
    %126 = vector.broadcast %107 : vector<1x32xf32> to vector<16x32xf32>
    %127 = arith.addf %125, %126 : vector<16x32xf32>
    %c0_60 = arith.constant 0 : index
    %c0_61 = arith.constant 0 : index
    %c0_62 = arith.constant 0 : index
    %128 = vector.load %arg6[%c0_60, %c0_61, %c0_62] : memref<2x32x64xf32, #tpu.memory_space<vmem>>, vector<1x32x64xf32>
    %129 = vector.shape_cast %128 : vector<1x32x64xf32> to vector<32x64xf32>
    %cst_63 = arith.constant dense<0.000000e+00> : vector<16x64xf32>
    %130 = tpu.matmul %127, %129, %cst_63 {dimension_numbers = #tpu.dot_dimension_numbers<[1], [0], [0], [1], [0, 0, 1, 1], [], []>} : vector<16x32xf32>, vector<32x64xf32>, vector<16x64xf32> -> vector<16x64xf32>
    %c0_64 = arith.constant 0 : index
    %c0_65 = arith.constant 0 : index
    %c0_66 = arith.constant 0 : index
    %131 = vector.load %arg7[%c0_64, %c0_65, %c0_66] : memref<2x1x64xf32, #tpu.memory_space<vmem>>, vector<1x1x64xf32>
    %132 = vector.shape_cast %131 : vector<1x1x64xf32> to vector<1x64xf32>
    %133 = vector.broadcast %132 : vector<1x64xf32> to vector<16x64xf32>
    %134 = arith.addf %130, %133 : vector<16x64xf32>
    %cst_67 = arith.constant 0.000000e+00 : f32
    %135 = vector.broadcast %cst_67 : f32 to vector<16x64xf32>
    %136 = arith.maximumf %134, %135 : vector<16x64xf32>
    %c0_68 = arith.constant 0 : index
    %c0_69 = arith.constant 0 : index
    %c0_70 = arith.constant 0 : index
    %137 = vector.load %arg8[%c0_68, %c0_69, %c0_70] : memref<2x64x32xf32, #tpu.memory_space<vmem>>, vector<1x64x32xf32>
    %138 = vector.shape_cast %137 : vector<1x64x32xf32> to vector<64x32xf32>
    %cst_71 = arith.constant dense<0.000000e+00> : vector<16x32xf32>
    %139 = tpu.matmul %136, %138, %cst_71 {dimension_numbers = #tpu.dot_dimension_numbers<[1], [0], [0], [1], [0, 0, 1, 1], [], []>} : vector<16x64xf32>, vector<64x32xf32>, vector<16x32xf32> -> vector<16x32xf32>
    %c0_72 = arith.constant 0 : index
    %c0_73 = arith.constant 0 : index
    %c0_74 = arith.constant 0 : index
    %140 = vector.load %arg9[%c0_72, %c0_73, %c0_74] : memref<2x1x32xf32, #tpu.memory_space<vmem>>, vector<1x1x32xf32>
    %141 = vector.shape_cast %140 : vector<1x1x32xf32> to vector<1x32xf32>
    %142 = vector.broadcast %141 : vector<1x32xf32> to vector<16x32xf32>
    %143 = arith.addf %139, %142 : vector<16x32xf32>
    %144 = arith.addf %127, %143 : vector<16x32xf32>
    %c0_75 = arith.constant 0 : index
    %c0_76 = arith.constant 0 : index
    %c0_77 = arith.constant 0 : index
    %145 = vector.load %arg12[%c0_75, %c0_76, %c0_77] : memref<2x1x32xf32, #tpu.memory_space<vmem>>, vector<1x1x32xf32>
    %146 = vector.shape_cast %145 : vector<1x1x32xf32> to vector<1x32xf32>
    %c0_78 = arith.constant 0 : index
    %c0_79 = arith.constant 0 : index
    %c0_80 = arith.constant 0 : index
    %147 = vector.load %arg13[%c0_78, %c0_79, %c0_80] : memref<2x1x32xf32, #tpu.memory_space<vmem>>, vector<1x1x32xf32>
    %148 = vector.shape_cast %147 : vector<1x1x32xf32> to vector<1x32xf32>
    %cst_81 = arith.constant dense<0.000000e+00> : vector<16xf32>
    %149 = vector.multi_reduction <add>, %144, %cst_81 [1] : vector<16x32xf32> to vector<16xf32>
    %150 = vector.shape_cast %149 : vector<16xf32> to vector<16x1xf32>
    %cst_82 = arith.constant 3.200000e+01 : f32
    %151 = vector.broadcast %cst_82 : f32 to vector<16x1xf32>
    %152 = arith.divf %150, %151 : vector<16x1xf32>
    %153 = vector.broadcast %152 : vector<16x1xf32> to vector<16x32xf32>
    %154 = arith.subf %144, %153 : vector<16x32xf32>
    %155 = arith.mulf %154, %154 : vector<16x32xf32>
    %cst_83 = arith.constant dense<0.000000e+00> : vector<16xf32>
    %156 = vector.multi_reduction <add>, %155, %cst_83 [1] : vector<16x32xf32> to vector<16xf32>
    %157 = vector.shape_cast %156 : vector<16xf32> to vector<16x1xf32>
    %cst_84 = arith.constant 3.200000e+01 : f32
    %158 = vector.broadcast %cst_84 : f32 to vector<16x1xf32>
    %159 = arith.divf %157, %158 : vector<16x1xf32>
    %cst_85 = arith.constant 9.99999974E-6 : f32
    %160 = vector.broadcast %cst_85 : f32 to vector<16x1xf32>
    %161 = arith.addf %159, %160 : vector<16x1xf32>
    %162 = math.rsqrt %161 : vector<16x1xf32>
    %163 = vector.broadcast %162 : vector<16x1xf32> to vector<16x32xf32>
    %164 = arith.mulf %154, %163 : vector<16x32xf32>
    %165 = vector.broadcast %146 : vector<1x32xf32> to vector<16x32xf32>
    %166 = arith.mulf %164, %165 : vector<16x32xf32>
    %167 = vector.broadcast %148 : vector<1x32xf32> to vector<16x32xf32>
    %168 = arith.addf %166, %167 : vector<16x32xf32>
    %c1_86 = arith.constant 1 : index
    %c0_87 = arith.constant 0 : index
    %c0_88 = arith.constant 0 : index
    %169 = vector.load %arg2[%c1_86, %c0_87, %c0_88] : memref<2x32x96xf32, #tpu.memory_space<vmem>>, vector<1x32x96xf32>
    %170 = vector.shape_cast %169 : vector<1x32x96xf32> to vector<32x96xf32>
    %cst_89 = arith.constant dense<0.000000e+00> : vector<16x96xf32>
    %171 = tpu.matmul %168, %170, %cst_89 {dimension_numbers = #tpu.dot_dimension_numbers<[1], [0], [0], [1], [0, 0, 1, 1], [], []>} : vector<16x32xf32>, vector<32x96xf32>, vector<16x96xf32> -> vector<16x96xf32>
    %c1_90 = arith.constant 1 : index
    %c0_91 = arith.constant 0 : index
    %c0_92 = arith.constant 0 : index
    %172 = vector.load %arg3[%c1_90, %c0_91, %c0_92] : memref<2x1x96xf32, #tpu.memory_space<vmem>>, vector<1x1x96xf32>
    %173 = vector.shape_cast %172 : vector<1x1x96xf32> to vector<1x96xf32>
    %174 = vector.broadcast %173 : vector<1x96xf32> to vector<16x96xf32>
    %175 = arith.addf %171, %174 : vector<16x96xf32>
    %176 = vector.shape_cast %175 : vector<16x96xf32> to vector<2x8x96xf32>
    %cst_93 = arith.constant 0.000000e+00 : f32
    %177 = vector.broadcast %cst_93 : f32 to vector<16x32xf32>
    %178 = vector.extract_strided_slice %176 {offsets = [0, 0, 0], sizes = [2, 8, 8], strides = [1, 1, 1]} : vector<2x8x96xf32> to vector<2x8x8xf32>
    %179 = vector.extract_strided_slice %176 {offsets = [0, 0, 32], sizes = [2, 8, 8], strides = [1, 1, 1]} : vector<2x8x96xf32> to vector<2x8x8xf32>
    %180 = vector.extract_strided_slice %176 {offsets = [0, 0, 64], sizes = [2, 8, 8], strides = [1, 1, 1]} : vector<2x8x96xf32> to vector<2x8x8xf32>
    "tpu.trace_start"() <{level = 10 : i32, message = "bid,bjd->bij"}> : () -> ()
    %cst_94 = arith.constant dense<0.000000e+00> : vector<2x8x8xf32>
    %181 = tpu.matmul %178, %179, %cst_94 {dimension_numbers = #tpu.dot_dimension_numbers<[2], [2], [1], [1], [0, 0, 0, 1, 1, 1], [0], [0]>} : vector<2x8x8xf32>, vector<2x8x8xf32>, vector<2x8x8xf32> -> vector<2x8x8xf32>
    "tpu.trace_stop"() : () -> ()
    %cst_95 = arith.constant 0.353553385 : f32
    %182 = vector.broadcast %cst_95 : f32 to vector<2x8x8xf32>
    %183 = arith.mulf %181, %182 : vector<2x8x8xf32>
    %cst_96 = arith.constant dense<0xFF800000> : vector<2x8xf32>
    %184 = vector.multi_reduction <maximumf>, %183, %cst_96 [2] : vector<2x8x8xf32> to vector<2x8xf32>
    %185 = vector.shape_cast %184 : vector<2x8xf32> to vector<2x8x1xf32>
    %186 = vector.broadcast %185 : vector<2x8x1xf32> to vector<2x8x8xf32>
    %187 = arith.subf %183, %186 : vector<2x8x8xf32>
    %188 = math.exp %187 : vector<2x8x8xf32>
    %cst_97 = arith.constant dense<0.000000e+00> : vector<2x8xf32>
    %189 = vector.multi_reduction <add>, %188, %cst_97 [2] : vector<2x8x8xf32> to vector<2x8xf32>
    %190 = vector.shape_cast %189 : vector<2x8xf32> to vector<2x8x1xf32>
    %191 = tpu.reciprocal %190 : vector<2x8x1xf32> -> vector<2x8x1xf32>
    %192 = vector.broadcast %191 : vector<2x8x1xf32> to vector<2x8x8xf32>
    %193 = arith.mulf %188, %192 : vector<2x8x8xf32>
    "tpu.trace_start"() <{level = 10 : i32, message = "bij,bjd->bid"}> : () -> ()
    %cst_98 = arith.constant dense<0.000000e+00> : vector<2x8x8xf32>
    %194 = tpu.matmul %193, %180, %cst_98 {dimension_numbers = #tpu.dot_dimension_numbers<[2], [1], [1], [2], [0, 0, 0, 1, 1, 2], [0], [0]>} : vector<2x8x8xf32>, vector<2x8x8xf32>, vector<2x8x8xf32> -> vector<2x8x8xf32>
    "tpu.trace_stop"() : () -> ()
    %195 = vector.shape_cast %194 : vector<2x8x8xf32> to vector<16x8xf32>
    %c1_99 = arith.constant 1 : index
    %c0_100 = arith.constant 0 : index
    %c0_101 = arith.constant 0 : index
    %c0_102 = arith.constant 0 : index
    %196 = vector.load %arg4[%c1_99, %c0_100, %c0_101, %c0_102] : memref<2x4x8x32xf32, #tpu.memory_space<vmem>>, vector<1x1x8x32xf32>
    %197 = vector.shape_cast %196 : vector<1x1x8x32xf32> to vector<8x32xf32>
    %cst_103 = arith.constant dense<0.000000e+00> : vector<16x32xf32>
    %198 = tpu.matmul %195, %197, %cst_103 {dimension_numbers = #tpu.dot_dimension_numbers<[1], [0], [0], [1], [0, 0, 1, 1], [], []>} : vector<16x8xf32>, vector<8x32xf32>, vector<16x32xf32> -> vector<16x32xf32>
    %199 = arith.addf %177, %198 : vector<16x32xf32>
    %200 = vector.extract_strided_slice %176 {offsets = [0, 0, 8], sizes = [2, 8, 8], strides = [1, 1, 1]} : vector<2x8x96xf32> to vector<2x8x8xf32>
    %201 = vector.extract_strided_slice %176 {offsets = [0, 0, 40], sizes = [2, 8, 8], strides = [1, 1, 1]} : vector<2x8x96xf32> to vector<2x8x8xf32>
    %202 = vector.extract_strided_slice %176 {offsets = [0, 0, 72], sizes = [2, 8, 8], strides = [1, 1, 1]} : vector<2x8x96xf32> to vector<2x8x8xf32>
    "tpu.trace_start"() <{level = 10 : i32, message = "bid,bjd->bij"}> : () -> ()
    %cst_104 = arith.constant dense<0.000000e+00> : vector<2x8x8xf32>
    %203 = tpu.matmul %200, %201, %cst_104 {dimension_numbers = #tpu.dot_dimension_numbers<[2], [2], [1], [1], [0, 0, 0, 1, 1, 1], [0], [0]>} : vector<2x8x8xf32>, vector<2x8x8xf32>, vector<2x8x8xf32> -> vector<2x8x8xf32>
    "tpu.trace_stop"() : () -> ()
    %cst_105 = arith.constant 0.353553385 : f32
    %204 = vector.broadcast %cst_105 : f32 to vector<2x8x8xf32>
    %205 = arith.mulf %203, %204 : vector<2x8x8xf32>
    %cst_106 = arith.constant dense<0xFF800000> : vector<2x8xf32>
    %206 = vector.multi_reduction <maximumf>, %205, %cst_106 [2] : vector<2x8x8xf32> to vector<2x8xf32>
    %207 = vector.shape_cast %206 : vector<2x8xf32> to vector<2x8x1xf32>
    %208 = vector.broadcast %207 : vector<2x8x1xf32> to vector<2x8x8xf32>
    %209 = arith.subf %205, %208 : vector<2x8x8xf32>
    %210 = math.exp %209 : vector<2x8x8xf32>
    %cst_107 = arith.constant dense<0.000000e+00> : vector<2x8xf32>
    %211 = vector.multi_reduction <add>, %210, %cst_107 [2] : vector<2x8x8xf32> to vector<2x8xf32>
    %212 = vector.shape_cast %211 : vector<2x8xf32> to vector<2x8x1xf32>
    %213 = tpu.reciprocal %212 : vector<2x8x1xf32> -> vector<2x8x1xf32>
    %214 = vector.broadcast %213 : vector<2x8x1xf32> to vector<2x8x8xf32>
    %215 = arith.mulf %210, %214 : vector<2x8x8xf32>
    "tpu.trace_start"() <{level = 10 : i32, message = "bij,bjd->bid"}> : () -> ()
    %cst_108 = arith.constant dense<0.000000e+00> : vector<2x8x8xf32>
    %216 = tpu.matmul %215, %202, %cst_108 {dimension_numbers = #tpu.dot_dimension_numbers<[2], [1], [1], [2], [0, 0, 0, 1, 1, 2], [0], [0]>} : vector<2x8x8xf32>, vector<2x8x8xf32>, vector<2x8x8xf32> -> vector<2x8x8xf32>
    "tpu.trace_stop"() : () -> ()
    %217 = vector.shape_cast %216 : vector<2x8x8xf32> to vector<16x8xf32>
    %c1_109 = arith.constant 1 : index
    %c1_110 = arith.constant 1 : index
    %c0_111 = arith.constant 0 : index
    %c0_112 = arith.constant 0 : index
    %218 = vector.load %arg4[%c1_109, %c1_110, %c0_111, %c0_112] : memref<2x4x8x32xf32, #tpu.memory_space<vmem>>, vector<1x1x8x32xf32>
    %219 = vector.shape_cast %218 : vector<1x1x8x32xf32> to vector<8x32xf32>
    %cst_113 = arith.constant dense<0.000000e+00> : vector<16x32xf32>
    %220 = tpu.matmul %217, %219, %cst_113 {dimension_numbers = #tpu.dot_dimension_numbers<[1], [0], [0], [1], [0, 0, 1, 1], [], []>} : vector<16x8xf32>, vector<8x32xf32>, vector<16x32xf32> -> vector<16x32xf32>
    %221 = arith.addf %199, %220 : vector<16x32xf32>
    %222 = vector.extract_strided_slice %176 {offsets = [0, 0, 16], sizes = [2, 8, 8], strides = [1, 1, 1]} : vector<2x8x96xf32> to vector<2x8x8xf32>
    %223 = vector.extract_strided_slice %176 {offsets = [0, 0, 48], sizes = [2, 8, 8], strides = [1, 1, 1]} : vector<2x8x96xf32> to vector<2x8x8xf32>
    %224 = vector.extract_strided_slice %176 {offsets = [0, 0, 80], sizes = [2, 8, 8], strides = [1, 1, 1]} : vector<2x8x96xf32> to vector<2x8x8xf32>
    "tpu.trace_start"() <{level = 10 : i32, message = "bid,bjd->bij"}> : () -> ()
    %cst_114 = arith.constant dense<0.000000e+00> : vector<2x8x8xf32>
    %225 = tpu.matmul %222, %223, %cst_114 {dimension_numbers = #tpu.dot_dimension_numbers<[2], [2], [1], [1], [0, 0, 0, 1, 1, 1], [0], [0]>} : vector<2x8x8xf32>, vector<2x8x8xf32>, vector<2x8x8xf32> -> vector<2x8x8xf32>
    "tpu.trace_stop"() : () -> ()
    %cst_115 = arith.constant 0.353553385 : f32
    %226 = vector.broadcast %cst_115 : f32 to vector<2x8x8xf32>
    %227 = arith.mulf %225, %226 : vector<2x8x8xf32>
    %cst_116 = arith.constant dense<0xFF800000> : vector<2x8xf32>
    %228 = vector.multi_reduction <maximumf>, %227, %cst_116 [2] : vector<2x8x8xf32> to vector<2x8xf32>
    %229 = vector.shape_cast %228 : vector<2x8xf32> to vector<2x8x1xf32>
    %230 = vector.broadcast %229 : vector<2x8x1xf32> to vector<2x8x8xf32>
    %231 = arith.subf %227, %230 : vector<2x8x8xf32>
    %232 = math.exp %231 : vector<2x8x8xf32>
    %cst_117 = arith.constant dense<0.000000e+00> : vector<2x8xf32>
    %233 = vector.multi_reduction <add>, %232, %cst_117 [2] : vector<2x8x8xf32> to vector<2x8xf32>
    %234 = vector.shape_cast %233 : vector<2x8xf32> to vector<2x8x1xf32>
    %235 = tpu.reciprocal %234 : vector<2x8x1xf32> -> vector<2x8x1xf32>
    %236 = vector.broadcast %235 : vector<2x8x1xf32> to vector<2x8x8xf32>
    %237 = arith.mulf %232, %236 : vector<2x8x8xf32>
    "tpu.trace_start"() <{level = 10 : i32, message = "bij,bjd->bid"}> : () -> ()
    %cst_118 = arith.constant dense<0.000000e+00> : vector<2x8x8xf32>
    %238 = tpu.matmul %237, %224, %cst_118 {dimension_numbers = #tpu.dot_dimension_numbers<[2], [1], [1], [2], [0, 0, 0, 1, 1, 2], [0], [0]>} : vector<2x8x8xf32>, vector<2x8x8xf32>, vector<2x8x8xf32> -> vector<2x8x8xf32>
    "tpu.trace_stop"() : () -> ()
    %239 = vector.shape_cast %238 : vector<2x8x8xf32> to vector<16x8xf32>
    %c1_119 = arith.constant 1 : index
    %c2_120 = arith.constant 2 : index
    %c0_121 = arith.constant 0 : index
    %c0_122 = arith.constant 0 : index
    %240 = vector.load %arg4[%c1_119, %c2_120, %c0_121, %c0_122] : memref<2x4x8x32xf32, #tpu.memory_space<vmem>>, vector<1x1x8x32xf32>
    %241 = vector.shape_cast %240 : vector<1x1x8x32xf32> to vector<8x32xf32>
    %cst_123 = arith.constant dense<0.000000e+00> : vector<16x32xf32>
    %242 = tpu.matmul %239, %241, %cst_123 {dimension_numbers = #tpu.dot_dimension_numbers<[1], [0], [0], [1], [0, 0, 1, 1], [], []>} : vector<16x8xf32>, vector<8x32xf32>, vector<16x32xf32> -> vector<16x32xf32>
    %243 = arith.addf %221, %242 : vector<16x32xf32>
    %244 = vector.extract_strided_slice %176 {offsets = [0, 0, 24], sizes = [2, 8, 8], strides = [1, 1, 1]} : vector<2x8x96xf32> to vector<2x8x8xf32>
    %245 = vector.extract_strided_slice %176 {offsets = [0, 0, 56], sizes = [2, 8, 8], strides = [1, 1, 1]} : vector<2x8x96xf32> to vector<2x8x8xf32>
    %246 = vector.extract_strided_slice %176 {offsets = [0, 0, 88], sizes = [2, 8, 8], strides = [1, 1, 1]} : vector<2x8x96xf32> to vector<2x8x8xf32>
    "tpu.trace_start"() <{level = 10 : i32, message = "bid,bjd->bij"}> : () -> ()
    %cst_124 = arith.constant dense<0.000000e+00> : vector<2x8x8xf32>
    %247 = tpu.matmul %244, %245, %cst_124 {dimension_numbers = #tpu.dot_dimension_numbers<[2], [2], [1], [1], [0, 0, 0, 1, 1, 1], [0], [0]>} : vector<2x8x8xf32>, vector<2x8x8xf32>, vector<2x8x8xf32> -> vector<2x8x8xf32>
    "tpu.trace_stop"() : () -> ()
    %cst_125 = arith.constant 0.353553385 : f32
    %248 = vector.broadcast %cst_125 : f32 to vector<2x8x8xf32>
    %249 = arith.mulf %247, %248 : vector<2x8x8xf32>
    %cst_126 = arith.constant dense<0xFF800000> : vector<2x8xf32>
    %250 = vector.multi_reduction <maximumf>, %249, %cst_126 [2] : vector<2x8x8xf32> to vector<2x8xf32>
    %251 = vector.shape_cast %250 : vector<2x8xf32> to vector<2x8x1xf32>
    %252 = vector.broadcast %251 : vector<2x8x1xf32> to vector<2x8x8xf32>
    %253 = arith.subf %249, %252 : vector<2x8x8xf32>
    %254 = math.exp %253 : vector<2x8x8xf32>
    %cst_127 = arith.constant dense<0.000000e+00> : vector<2x8xf32>
    %255 = vector.multi_reduction <add>, %254, %cst_127 [2] : vector<2x8x8xf32> to vector<2x8xf32>
    %256 = vector.shape_cast %255 : vector<2x8xf32> to vector<2x8x1xf32>
    %257 = tpu.reciprocal %256 : vector<2x8x1xf32> -> vector<2x8x1xf32>
    %258 = vector.broadcast %257 : vector<2x8x1xf32> to vector<2x8x8xf32>
    %259 = arith.mulf %254, %258 : vector<2x8x8xf32>
    "tpu.trace_start"() <{level = 10 : i32, message = "bij,bjd->bid"}> : () -> ()
    %cst_128 = arith.constant dense<0.000000e+00> : vector<2x8x8xf32>
    %260 = tpu.matmul %259, %246, %cst_128 {dimension_numbers = #tpu.dot_dimension_numbers<[2], [1], [1], [2], [0, 0, 0, 1, 1, 2], [0], [0]>} : vector<2x8x8xf32>, vector<2x8x8xf32>, vector<2x8x8xf32> -> vector<2x8x8xf32>
    "tpu.trace_stop"() : () -> ()
    %261 = vector.shape_cast %260 : vector<2x8x8xf32> to vector<16x8xf32>
    %c1_129 = arith.constant 1 : index
    %c3_130 = arith.constant 3 : index
    %c0_131 = arith.constant 0 : index
    %c0_132 = arith.constant 0 : index
    %262 = vector.load %arg4[%c1_129, %c3_130, %c0_131, %c0_132] : memref<2x4x8x32xf32, #tpu.memory_space<vmem>>, vector<1x1x8x32xf32>
    %263 = vector.shape_cast %262 : vector<1x1x8x32xf32> to vector<8x32xf32>
    %cst_133 = arith.constant dense<0.000000e+00> : vector<16x32xf32>
    %264 = tpu.matmul %261, %263, %cst_133 {dimension_numbers = #tpu.dot_dimension_numbers<[1], [0], [0], [1], [0, 0, 1, 1], [], []>} : vector<16x8xf32>, vector<8x32xf32>, vector<16x32xf32> -> vector<16x32xf32>
    %265 = arith.addf %243, %264 : vector<16x32xf32>
    %c1_134 = arith.constant 1 : index
    %c0_135 = arith.constant 0 : index
    %c0_136 = arith.constant 0 : index
    %266 = vector.load %arg5[%c1_134, %c0_135, %c0_136] : memref<2x1x32xf32, #tpu.memory_space<vmem>>, vector<1x1x32xf32>
    %267 = vector.shape_cast %266 : vector<1x1x32xf32> to vector<1x32xf32>
    %268 = vector.broadcast %267 : vector<1x32xf32> to vector<16x32xf32>
    %269 = arith.addf %265, %268 : vector<16x32xf32>
    %270 = arith.addf %168, %269 : vector<16x32xf32>
    %c1_137 = arith.constant 1 : index
    %c0_138 = arith.constant 0 : index
    %c0_139 = arith.constant 0 : index
    %271 = vector.load %arg10[%c1_137, %c0_138, %c0_139] : memref<2x1x32xf32, #tpu.memory_space<vmem>>, vector<1x1x32xf32>
    %272 = vector.shape_cast %271 : vector<1x1x32xf32> to vector<1x32xf32>
    %c1_140 = arith.constant 1 : index
    %c0_141 = arith.constant 0 : index
    %c0_142 = arith.constant 0 : index
    %273 = vector.load %arg11[%c1_140, %c0_141, %c0_142] : memref<2x1x32xf32, #tpu.memory_space<vmem>>, vector<1x1x32xf32>
    %274 = vector.shape_cast %273 : vector<1x1x32xf32> to vector<1x32xf32>
    %cst_143 = arith.constant dense<0.000000e+00> : vector<16xf32>
    %275 = vector.multi_reduction <add>, %270, %cst_143 [1] : vector<16x32xf32> to vector<16xf32>
    %276 = vector.shape_cast %275 : vector<16xf32> to vector<16x1xf32>
    %cst_144 = arith.constant 3.200000e+01 : f32
    %277 = vector.broadcast %cst_144 : f32 to vector<16x1xf32>
    %278 = arith.divf %276, %277 : vector<16x1xf32>
    %279 = vector.broadcast %278 : vector<16x1xf32> to vector<16x32xf32>
    %280 = arith.subf %270, %279 : vector<16x32xf32>
    %281 = arith.mulf %280, %280 : vector<16x32xf32>
    %cst_145 = arith.constant dense<0.000000e+00> : vector<16xf32>
    %282 = vector.multi_reduction <add>, %281, %cst_145 [1] : vector<16x32xf32> to vector<16xf32>
    %283 = vector.shape_cast %282 : vector<16xf32> to vector<16x1xf32>
    %cst_146 = arith.constant 3.200000e+01 : f32
    %284 = vector.broadcast %cst_146 : f32 to vector<16x1xf32>
    %285 = arith.divf %283, %284 : vector<16x1xf32>
    %cst_147 = arith.constant 9.99999974E-6 : f32
    %286 = vector.broadcast %cst_147 : f32 to vector<16x1xf32>
    %287 = arith.addf %285, %286 : vector<16x1xf32>
    %288 = math.rsqrt %287 : vector<16x1xf32>
    %289 = vector.broadcast %288 : vector<16x1xf32> to vector<16x32xf32>
    %290 = arith.mulf %280, %289 : vector<16x32xf32>
    %291 = vector.broadcast %272 : vector<1x32xf32> to vector<16x32xf32>
    %292 = arith.mulf %290, %291 : vector<16x32xf32>
    %293 = vector.broadcast %274 : vector<1x32xf32> to vector<16x32xf32>
    %294 = arith.addf %292, %293 : vector<16x32xf32>
    %c1_148 = arith.constant 1 : index
    %c0_149 = arith.constant 0 : index
    %c0_150 = arith.constant 0 : index
    %295 = vector.load %arg6[%c1_148, %c0_149, %c0_150] : memref<2x32x64xf32, #tpu.memory_space<vmem>>, vector<1x32x64xf32>
    %296 = vector.shape_cast %295 : vector<1x32x64xf32> to vector<32x64xf32>
    %cst_151 = arith.constant dense<0.000000e+00> : vector<16x64xf32>
    %297 = tpu.matmul %294, %296, %cst_151 {dimension_numbers = #tpu.dot_dimension_numbers<[1], [0], [0], [1], [0, 0, 1, 1], [], []>} : vector<16x32xf32>, vector<32x64xf32>, vector<16x64xf32> -> vector<16x64xf32>
    %c1_152 = arith.constant 1 : index
    %c0_153 = arith.constant 0 : index
    %c0_154 = arith.constant 0 : index
    %298 = vector.load %arg7[%c1_152, %c0_153, %c0_154] : memref<2x1x64xf32, #tpu.memory_space<vmem>>, vector<1x1x64xf32>
    %299 = vector.shape_cast %298 : vector<1x1x64xf32> to vector<1x64xf32>
    %300 = vector.broadcast %299 : vector<1x64xf32> to vector<16x64xf32>
    %301 = arith.addf %297, %300 : vector<16x64xf32>
    %cst_155 = arith.constant 0.000000e+00 : f32
    %302 = vector.broadcast %cst_155 : f32 to vector<16x64xf32>
    %303 = arith.maximumf %301, %302 : vector<16x64xf32>
    %c1_156 = arith.constant 1 : index
    %c0_157 = arith.constant 0 : index
    %c0_158 = arith.constant 0 : index
    %304 = vector.load %arg8[%c1_156, %c0_157, %c0_158] : memref<2x64x32xf32, #tpu.memory_space<vmem>>, vector<1x64x32xf32>
    %305 = vector.shape_cast %304 : vector<1x64x32xf32> to vector<64x32xf32>
    %cst_159 = arith.constant dense<0.000000e+00> : vector<16x32xf32>
    %306 = tpu.matmul %303, %305, %cst_159 {dimension_numbers = #tpu.dot_dimension_numbers<[1], [0], [0], [1], [0, 0, 1, 1], [], []>} : vector<16x64xf32>, vector<64x32xf32>, vector<16x32xf32> -> vector<16x32xf32>
    %c1_160 = arith.constant 1 : index
    %c0_161 = arith.constant 0 : index
    %c0_162 = arith.constant 0 : index
    %307 = vector.load %arg9[%c1_160, %c0_161, %c0_162] : memref<2x1x32xf32, #tpu.memory_space<vmem>>, vector<1x1x32xf32>
    %308 = vector.shape_cast %307 : vector<1x1x32xf32> to vector<1x32xf32>
    %309 = vector.broadcast %308 : vector<1x32xf32> to vector<16x32xf32>
    %310 = arith.addf %306, %309 : vector<16x32xf32>
    %311 = arith.addf %294, %310 : vector<16x32xf32>
    %c1_163 = arith.constant 1 : index
    %c0_164 = arith.constant 0 : index
    %c0_165 = arith.constant 0 : index
    %312 = vector.load %arg12[%c1_163, %c0_164, %c0_165] : memref<2x1x32xf32, #tpu.memory_space<vmem>>, vector<1x1x32xf32>
    %313 = vector.shape_cast %312 : vector<1x1x32xf32> to vector<1x32xf32>
    %c1_166 = arith.constant 1 : index
    %c0_167 = arith.constant 0 : index
    %c0_168 = arith.constant 0 : index
    %314 = vector.load %arg13[%c1_166, %c0_167, %c0_168] : memref<2x1x32xf32, #tpu.memory_space<vmem>>, vector<1x1x32xf32>
    %315 = vector.shape_cast %314 : vector<1x1x32xf32> to vector<1x32xf32>
    %cst_169 = arith.constant dense<0.000000e+00> : vector<16xf32>
    %316 = vector.multi_reduction <add>, %311, %cst_169 [1] : vector<16x32xf32> to vector<16xf32>
    %317 = vector.shape_cast %316 : vector<16xf32> to vector<16x1xf32>
    %cst_170 = arith.constant 3.200000e+01 : f32
    %318 = vector.broadcast %cst_170 : f32 to vector<16x1xf32>
    %319 = arith.divf %317, %318 : vector<16x1xf32>
    %320 = vector.broadcast %319 : vector<16x1xf32> to vector<16x32xf32>
    %321 = arith.subf %311, %320 : vector<16x32xf32>
    %322 = arith.mulf %321, %321 : vector<16x32xf32>
    %cst_171 = arith.constant dense<0.000000e+00> : vector<16xf32>
    %323 = vector.multi_reduction <add>, %322, %cst_171 [1] : vector<16x32xf32> to vector<16xf32>
    %324 = vector.shape_cast %323 : vector<16xf32> to vector<16x1xf32>
    %cst_172 = arith.constant 3.200000e+01 : f32
    %325 = vector.broadcast %cst_172 : f32 to vector<16x1xf32>
    %326 = arith.divf %324, %325 : vector<16x1xf32>
    %cst_173 = arith.constant 9.99999974E-6 : f32
    %327 = vector.broadcast %cst_173 : f32 to vector<16x1xf32>
    %328 = arith.addf %326, %327 : vector<16x1xf32>
    %329 = math.rsqrt %328 : vector<16x1xf32>
    %330 = vector.broadcast %329 : vector<16x1xf32> to vector<16x32xf32>
    %331 = arith.mulf %321, %330 : vector<16x32xf32>
    %332 = vector.broadcast %313 : vector<1x32xf32> to vector<16x32xf32>
    %333 = arith.mulf %331, %332 : vector<16x32xf32>
    %334 = vector.broadcast %315 : vector<1x32xf32> to vector<16x32xf32>
    %335 = arith.addf %333, %334 : vector<16x32xf32>
    %c0_174 = arith.constant 0 : index
    %c0_175 = arith.constant 0 : index
    %336 = vector.load %arg14[%c0_174, %c0_175] : memref<1x32xf32, #tpu.memory_space<vmem>>, vector<1x32xf32>
    %c0_176 = arith.constant 0 : index
    %c0_177 = arith.constant 0 : index
    %337 = vector.load %arg15[%c0_176, %c0_177] : memref<1x32xf32, #tpu.memory_space<vmem>>, vector<1x32xf32>
    %cst_178 = arith.constant dense<0.000000e+00> : vector<16xf32>
    %338 = vector.multi_reduction <add>, %335, %cst_178 [1] : vector<16x32xf32> to vector<16xf32>
    %339 = vector.shape_cast %338 : vector<16xf32> to vector<16x1xf32>
    %cst_179 = arith.constant 3.200000e+01 : f32
    %340 = vector.broadcast %cst_179 : f32 to vector<16x1xf32>
    %341 = arith.divf %339, %340 : vector<16x1xf32>
    %342 = vector.broadcast %341 : vector<16x1xf32> to vector<16x32xf32>
    %343 = arith.subf %335, %342 : vector<16x32xf32>
    %344 = arith.mulf %343, %343 : vector<16x32xf32>
    %cst_180 = arith.constant dense<0.000000e+00> : vector<16xf32>
    %345 = vector.multi_reduction <add>, %344, %cst_180 [1] : vector<16x32xf32> to vector<16xf32>
    %346 = vector.shape_cast %345 : vector<16xf32> to vector<16x1xf32>
    %cst_181 = arith.constant 3.200000e+01 : f32
    %347 = vector.broadcast %cst_181 : f32 to vector<16x1xf32>
    %348 = arith.divf %346, %347 : vector<16x1xf32>
    %cst_182 = arith.constant 9.99999974E-6 : f32
    %349 = vector.broadcast %cst_182 : f32 to vector<16x1xf32>
    %350 = arith.addf %348, %349 : vector<16x1xf32>
    %351 = math.rsqrt %350 : vector<16x1xf32>
    %352 = vector.broadcast %351 : vector<16x1xf32> to vector<16x32xf32>
    %353 = arith.mulf %343, %352 : vector<16x32xf32>
    %354 = vector.broadcast %336 : vector<1x32xf32> to vector<16x32xf32>
    %355 = arith.mulf %353, %354 : vector<16x32xf32>
    %356 = vector.broadcast %337 : vector<1x32xf32> to vector<16x32xf32>
    %357 = arith.addf %355, %356 : vector<16x32xf32>
    %358 = vector.shape_cast %357 : vector<16x32xf32> to vector<2x8x32xf32>
    %c0_183 = arith.constant 0 : index
    %c0_184 = arith.constant 0 : index
    %c0_185 = arith.constant 0 : index
    %359 = vector.load %arg16[%c0_183, %c0_184, %c0_185] : memref<2x8x32xf32, #tpu.memory_space<vmem>>, vector<2x8x32xf32>
    tpu.vector_store %arg16[%c0_183, %c0_184, %c0_185], %358 {strides = array<i32>} : memref<2x8x32xf32, #tpu.memory_space<vmem>>, vector<2x8x32xf32>,
    return
  }
  func.func @transform_0(%arg0: i32) -> (i32, i32, i32) {
    %c0_i32 = arith.constant 0 : i32
    %c0_i32_0 = arith.constant 0 : i32
    %c0_i32_1 = arith.constant 0 : i32
    return %arg0, %c0_i32, %c0_i32_0 : i32, i32, i32
  }
  func.func @transform_1(%arg0: i32) -> (i32, i32, i32) {
    %c0_i32 = arith.constant 0 : i32
    %c0_i32_0 = arith.constant 0 : i32
    %c0_i32_1 = arith.constant 0 : i32
    %c0_i32_2 = arith.constant 0 : i32
    return %c0_i32, %c0_i32_0, %c0_i32_1 : i32, i32, i32
  }
  func.func @transform_2(%arg0: i32) -> (i32, i32, i32) {
    %c0_i32 = arith.constant 0 : i32
    %c0_i32_0 = arith.constant 0 : i32
    %c0_i32_1 = arith.constant 0 : i32
    %c0_i32_2 = arith.constant 0 : i32
    return %c0_i32, %c0_i32_0, %c0_i32_1 : i32, i32, i32
  }
  func.func @transform_3(%arg0: i32) -> (i32, i32, i32, i32) {
    %c0_i32 = arith.constant 0 : i32
    %c0_i32_0 = arith.constant 0 : i32
    %c0_i32_1 = arith.constant 0 : i32
    %c0_i32_2 = arith.constant 0 : i32
    %c0_i32_3 = arith.constant 0 : i32
    return %c0_i32, %c0_i32_0, %c0_i32_1, %c0_i32_2 : i32, i32, i32, i32
  }
  func.func @transform_4(%arg0: i32) -> (i32, i32, i32) {
    %c0_i32 = arith.constant 0 : i32
    %c0_i32_0 = arith.constant 0 : i32
    %c0_i32_1 = arith.constant 0 : i32
    %c0_i32_2 = arith.constant 0 : i32
    return %c0_i32, %c0_i32_0, %c0_i32_1 : i32, i32, i32
  }
  func.func @transform_5(%arg0: i32) -> (i32, i32, i32) {
    %c0_i32 = arith.constant 0 : i32
    %c0_i32_0 = arith.constant 0 : i32
    %c0_i32_1 = arith.constant 0 : i32
    %c0_i32_2 = arith.constant 0 : i32
    return %c0_i32, %c0_i32_0, %c0_i32_1 : i32, i32, i32
  }
  func.func @transform_6(%arg0: i32) -> (i32, i32, i32) {
    %c0_i32 = arith.constant 0 : i32
    %c0_i32_0 = arith.constant 0 : i32
    %c0_i32_1 = arith.constant 0 : i32
    %c0_i32_2 = arith.constant 0 : i32
    return %c0_i32, %c0_i32_0, %c0_i32_1 : i32, i32, i32
  }
  func.func @transform_7(%arg0: i32) -> (i32, i32, i32) {
    %c0_i32 = arith.constant 0 : i32
    %c0_i32_0 = arith.constant 0 : i32
    %c0_i32_1 = arith.constant 0 : i32
    %c0_i32_2 = arith.constant 0 : i32
    return %c0_i32, %c0_i32_0, %c0_i32_1 : i32, i32, i32
  }
  func.func @transform_8(%arg0: i32) -> (i32, i32, i32) {
    %c0_i32 = arith.constant 0 : i32
    %c0_i32_0 = arith.constant 0 : i32
    %c0_i32_1 = arith.constant 0 : i32
    %c0_i32_2 = arith.constant 0 : i32
    return %c0_i32, %c0_i32_0, %c0_i32_1 : i32, i32, i32
  }
  func.func @transform_9(%arg0: i32) -> (i32, i32, i32) {
    %c0_i32 = arith.constant 0 : i32
    %c0_i32_0 = arith.constant 0 : i32
    %c0_i32_1 = arith.constant 0 : i32
    %c0_i32_2 = arith.constant 0 : i32
    return %c0_i32, %c0_i32_0, %c0_i32_1 : i32, i32, i32
  }
  func.func @transform_10(%arg0: i32) -> (i32, i32, i32) {
    %c0_i32 = arith.constant 0 : i32
    %c0_i32_0 = arith.constant 0 : i32
    %c0_i32_1 = arith.constant 0 : i32
    %c0_i32_2 = arith.constant 0 : i32
    return %c0_i32, %c0_i32_0, %c0_i32_1 : i32, i32, i32
  }
  func.func @transform_11(%arg0: i32) -> (i32, i32, i32) {
    %c0_i32 = arith.constant 0 : i32
    %c0_i32_0 = arith.constant 0 : i32
    %c0_i32_1 = arith.constant 0 : i32
    %c0_i32_2 = arith.constant 0 : i32
    return %c0_i32, %c0_i32_0, %c0_i32_1 : i32, i32, i32
  }
  func.func @transform_12(%arg0: i32) -> (i32, i32, i32) {
    %c0_i32 = arith.constant 0 : i32
    %c0_i32_0 = arith.constant 0 : i32
    %c0_i32_1 = arith.constant 0 : i32
    %c0_i32_2 = arith.constant 0 : i32
    return %c0_i32, %c0_i32_0, %c0_i32_1 : i32, i32, i32
  }
  func.func @transform_13(%arg0: i32) -> (i32, i32) {
    %c0_i32 = arith.constant 0 : i32
    %c0_i32_0 = arith.constant 0 : i32
    %c0_i32_1 = arith.constant 0 : i32
    return %c0_i32, %c0_i32_0 : i32, i32
  }
  func.func @transform_14(%arg0: i32) -> (i32, i32) {
    %c0_i32 = arith.constant 0 : i32
    %c0_i32_0 = arith.constant 0 : i32
    %c0_i32_1 = arith.constant 0 : i32
    return %c0_i32, %c0_i32_0 : i32, i32
  }
  func.func @transform_15(%arg0: i32) -> (i32, i32, i32) {
    %c0_i32 = arith.constant 0 : i32
    %c0_i32_0 = arith.constant 0 : i32
    %c0_i32_1 = arith.constant 0 : i32
    return %arg0, %c0_i32, %c0_i32_0 : i32, i32, i32
  }
}

</mosaic_0001>

<bundles_post_ra>
// kernel: tpu_custom_call.1
= control target key start
LH: loop header
LB: loop body
LE: loop exit
PB: predicated region body
PF: predicated region fallthrough
CT: control target
= control target key end

     0   :  { %s6347_s0 = inlined_call_operand.hbm [shape: f32[4,8,32], index: 0, kind: input, shape index: {}]   ;;  %s6348_s1 = inlined_call_operand.vmem [shape: f32[2,32,96], index: 1, kind: input, shape index: {}]   ;;  %s6349_s2 = inlined_call_operand.vmem [shape: f32[2,1,96], index: 2, kind: input, shape index: {}]   ;;  %s6350_s3 = inlined_call_operand.vmem [shape: f32[2,4,8,32], index: 3, kind: input, shape index: {}]   ;;  %s6351_s4 = inlined_call_operand.vmem [shape: f32[2,1,32], index: 4, kind: input, shape index: {}]   ;;  %s6352_s5 = inlined_call_operand.vmem [shape: f32[2,32,64], index: 5, kind: input, shape index: {}]   ;;  %s6353_s6 = inlined_call_operand.vmem [shape: f32[2,1,64], index: 6, kind: input, shape index: {}]   ;;  %s6354_s7 = inlined_call_operand.vmem [shape: f32[2,64,32], index: 7, kind: input, shape index: {}]   ;;  %s6355_s8 = inlined_call_operand.vmem [shape: f32[2,1,32], index: 8, kind: input, shape index: {}]   ;;  %s6356_s9 = inlined_call_operand.vmem [shape: f32[2,1,32], index: 9, kind: input, shape index: {}]   ;;  %s6357_s10 = inlined_call_operand.vmem [shape: f32[2,1,32], index: 10, kind: input, shape index: {}]   ;;  %s6358_s11 = inlined_call_operand.vmem [shape: f32[2,1,32], index: 11, kind: input, shape index: {}]   ;;  %s6359_s12 = inlined_call_operand.vmem [shape: f32[2,1,32], index: 12, kind: input, shape index: {}]   ;;  %s6360_s13 = inlined_call_operand.vmem [shape: f32[1,32], index: 13, kind: input, shape index: {}]   ;;  %s6361_s14 = inlined_call_operand.vmem [shape: f32[1,32], index: 14, kind: input, shape index: {}]   ;;  %s6362_s15 = inlined_call_operand.hbm [shape: f32[4,8,32], index: 15, kind: output, shape index: {}]  }
   0x1   :  { %6386 = sst [smem:[#allocation14_spill]] %s6361_s14 }
   0x2   :  { %6387 = sst [smem:[#allocation15_spill]] %s6362_s15 }
   0x3   :  { %20 = vsyncpa [#allocation3], 0 }
   0x4   :  { %22 = vsyncpa [#allocation3 + $0x1], 0 }
   0x5   :  { %23 = vsyncpa [#allocation4], 0 }
   0x6   :  { %25 = vsyncpa [#allocation4 + $0x1], 0  ;;  %s5649_s18 = smov 0   ;;  %s5651_s19 = smov 0  }
   0x7   :  { %s5653_s20 = smov 0   ;;  %s5655_s21 = smov 0  }
   0x8 LB: > { %6388 = sst [smem:[#allocation8_spill]] %s5536_s18  ;;  %s5670_s22 = sadd.s32 4294967295, %s5548_s21   ;;  %s5548_s21 = sphi %s5655_s21, %s6415_s21   ;;  %s5544_s20 = sphi %s5653_s20, %s6417_s20   ;;  %s5540_s19 = sphi %s5651_s19, %s6419_s19   ;;  %s5536_s18 = sphi %s5649_s18, %s6418_s18  }
   0x9   : > { %6389 = sst [smem:[#allocation9_spill]] %s5544_s20  ;;  %s4754_s23 = sadd.s32 4294967294, %s5548_s21  }
   0xa   : > { %s5674_s24 = sadd.s32 1, %s5548_s21   ;;  %s38_s25 = sadd.s32 1, %s5544_s20 }
   0xb   : > { %6390 = sst [smem:[#allocation10_spill]] %s5674_s24  ;;  %s35_s26 = ssub.s32 %s5548_s21, %s5674_s24 }
   0xc   : > { %p45_p0 = scmp.ne.s32.totalorder %s5544_s20, %s5540_s19  ;;  %p36_p1 = scmp.eq.s32.totalorder %s35_s26, 0 }
   0xd   : > { %p46_p2 = scmp.eq.s32.totalorder %s5548_s21, 0  ;;  %p51_p3 = scmp.ne.s32.totalorder %s5540_s19, %s5536_s18 }
   0xe   : > { %p52_p4 = scmp.eq.s32.totalorder %s5670_s22, 0  ;;  %p369_p7 = scmp.eq.s32.totalorder %s5670_s22, 1 }
   0xf   : > { %s5686_s27 = scalar_select %p36_p1, %s5544_s20, %s38_s25  }
  0x10   : > { %p5688_p5 = por %p46_p2, %p45_p0  ;;  %p5692_p6 = por %p52_p4, %p51_p3 }
  0x11   : > { %6391 = sst [smem:[#allocation11_spill]] %s5686_s27  ;;  %p375_p8 = scmp.eq.s32.totalorder %s4754_s23, 1 }
  0x12   : > { %s6393_s29 = scalar_select %p5692_p6, 1, 0 }
  0x13   : > { %p5321_p10 = scmp.lt.s32.totalorder %s5548_s21, 2  ;;  %p5699_p11 = por %p369_p7, %p45_p0 }
  0x14   : > { %p5703_p12 = por %p375_p8, %p51_p3  ;;  %s437_s17 = sand.u32 1, %s5544_s20  }
  0x15   : > { %s6394_s30 = scalar_select %p5699_p11, 1, 0 }
  0x16   : > { %s6396_s16 = scalar_select %p5703_p12, 1, 0 }
  0x17   : > { %6395 = sst [smem:[#allocation12_spill]] %s6394_s30  ;;  %s4893_s25 = sshll.u32 %s5548_s21, 8 }
  0x18   : > { %6397 = sst [smem:[#allocation13_spill]] %s6396_s16  ;;  %s4757_s26 = sshll.u32 %s437_s17, 4 }
  0x19   : > { %s5712_s18 = scalar_lea.hbm %s6347_s0, %s4893_s25  ;;  %s441_s23 = scalar_lea.vmem [#allocation2], %s4757_s26 }
  0x1a   : > { %s448_s15 = sshll.u32 %s441_s23, 4  ;;  %p5716_p13 = pnand %p5321_p10, %p5688_p5  ;;  %s5720_s15 = int_to_ptr.vmem [resolvable:$true] %s448_s15 }
  0x1b   : > { %s5722_s20 = scalar_lea.sflag [#allocation3], %s437_s17  ;;  %s5456_s16 = scalar_lea.hbm %s5712_s18, 256 }
  0x1c   : > { %p5457_p0 = scmp.ne.s32.totalorder %s5712_s18, %s5456_s16  ;;  %p5458_p1 = pneg %p5716_p13 }
  0x1d   : > { %s5461_s25 = scalar_lea.hbm %s6347_s0, 512  ;;  %p5462_p4 = scmp.lt.s32.totalorder %s5712_s18, %s6347_s0 }
  0x1e   : > { %p5459_p2 = pnand %p5458_p1, %p5457_p0  ;;  %p5463_p5 = scmp.lt.s32.totalorder %s5461_s25, %s5456_s16 }
  0x20   : > { %p5460_p3 = pneg %p5459_p2  ;;  %p5464_p7 = por %p5463_p5, %p5462_p4 }
  0x22   : > { %p5465_p8 = pnand %p5464_p7, %p5460_p3 }
  0x24   : > { %5468 = shalt.err (!%p5465_p8)
}
  0x25   : > { %s5469_s17 = scalar_lea.vmem %s5720_s15, 256  ;;  %s5550_s23 = smov [#allocation2]  }
  0x26   : > { %p5470_p10 = scmp.ne.s32.totalorder %s5720_s15, %s5469_s17  ;;  %s5474_s14 = sshll.u32 %s5550_s23, 4  ;;  %s5475_s14 = int_to_ptr.vmem [resolvable:$false] %s5474_s14 }
  0x27   : > { %s5476_s24 = scalar_lea.vmem %s5475_s14, 512  ;;  %p5477_p2 = scmp.lt.s32.totalorder %s5720_s15, %s5475_s14 }
  0x28   : > { %p5472_p9 = pnand %p5470_p10, %p5458_p1  ;;  %p5478_p12 = scmp.lt.s32.totalorder %s5476_s24, %s5469_s17 }
  0x2a   : > { %p5473_p0 = pneg %p5472_p9  ;;  %p5479_p11 = por %p5478_p12, %p5477_p2 }
  0x2c   : > { %p5480_p6 = pnand %p5479_p11, %p5473_p0 }
  0x2e   : > { %5483 = shalt.err (!%p5480_p6)
}
  0x2f   : > { %s5551_s16 = smov 128   ;;  %s5552_s27 = smov 8  }
  0x30   : > { %5316 = dma.hbm_to_vmem [thread:$0]  (!%p5716_p13), %s5712_s18, 256, %s5720_s15, %s5722_s20, %s5551_s16, %s5551_s16, %s5552_s27  }
  0x31   : > { %p4760_p9 = scmp.ge.s32.totalorder %s5548_s21, 1  ;;  %p456_p1 = scmp.lt.s32.totalorder %s5548_s21, 3 }
  0x33   : > { %p457_p3 = pnand %p4760_p9, %p456_p1 }
  0x34   : > { %s5746_s14 = sand.u32 (!%p457_p3), 1, %s5540_s19   ;;  %p6399_p6 = scmp.ne.s32.totalorder (!%p457_p3), %s6393_s29, 0 }
  0x35   : > { %460 = sbr.rel (%p457_p3) target bundleno = 8707 (0x2203), region = 80  ;;  %s6373_s25 = sshll.u32 (!%p457_p3), %s5746_s14, 4 }
  0x36   : > { %s463_s28 = scalar_lea.sflag (!%p457_p3), [#allocation3], %s5746_s14  ;;  %s466_s26 = scalar_lea.vmem (!%p457_p3), [#allocation2], %s6373_s25 }
  0x3a   : > { %5527 = dma.done.wait (%p6399_p6), %s463_s28, 256  }
  0x3b   : > { %5529 = vsyncadd (%p6399_p6), %s463_s28, 4294967040  ;;  %vm528_vm0 = vcmask 261120   ;;  %v520_v0 = vld [vmem:[%s6348_s1 + $0x18] sm:$0xff]  ;;  %v519_v1 = vld [vmem:[%s6348_s1 + $0x10] sm:$0xff]  ;;  %v5553_v6 = vmov 0.0   ;;  %vm5554_vm1 = vmmov 0  }
  0x3c   : > { %5027 = vmatprep.subr.mxu0 %v520_v0  ;;  %v5762_v2 = vld [vmem:[%s466_s26] sm:$0xff]  ;;  %v518_v3 = vld [vmem:[%s6348_s1 + $0x8] sm:$0xff]  ;;  %5043 = vmatprep.subr.mxu1 %v5553_v6  ;;  %s5555_s28 = smov 96   ;;  %vm613_vm2 = vcmask 64512   ;;  %s5557_s15 = smov 120   ;;  %vm2437_vm3 = vcmask 523264  }
  0x3d   : > { %5028 = vmatpush3.msra.mxu0 %v520_v0  ;;  %5035 = vmatprep.mubr.msk.f32.mxu0 %vm528_vm0, %v5762_v2  ;;  %v517_v4 = vld [vmem:[%s6348_s1] sm:$0xff]  ;;  %v5772_v5 = vld [vmem:[%s466_s26 + $0x8] sm:$0xff]  ;;  %s5556_s26 = smov 64   ;;  %s5558_s18 = smov 88  }
  0x3e   : > { %5029 = vmatprep.subr.mxu0 %v519_v1  ;;  %5045 = vmatprep.mubr.msk.f32.mxu1 %vm5554_vm1, %v5553_v6  ;;  %v4763_v8 = vld [vmem:[%s6349_s2] ss:$0 sm:$0xff]  ;;  %s5559_s20 = smov 56   ;;  %s6382_s30 = smov 112  }
  0x3f   : > { %5030 = vmatpush3.msra.mxu0 %v519_v1  ;;  %s6384_s17 = smov 80   ;;  %s6380_s27 = smov 48  }
  0x40   : > { %5031 = vmatprep.subr.mxu0 %v518_v3  ;;  %s6378_s23 = smov 72   ;;  %s6376_s29 = smov 104  }
  0x41   : > { %5032 = vmatpush3.msra.mxu0 %v518_v3  ;;  %s6374_s24 = smov 40   ;;  %s6403_s25 = smov 72  }
  0x42   : > { %5033 = vmatprep.subr.mxu0 %v517_v4  ;;  %s6404_s16 = smov 104  }
  0x43   : > { %5034 = vmatpush3.msra.mxu0 %v517_v4  ;;  %v941_v4 = vld [vmem:[%s6350_s3] sm:$0xff] }
  0x44   : > { %5036 = vmatmul.mubr.msk.f32.vlgmr.msra.gmra.mxu0 %vm528_vm0, %v5772_v5  ;;  %5038 = vmatprep.subr.mxu0 %v5553_v6 }
  0x45   : > { %5040 = vmatprep.mubr.msk.f32.mxu0 %vm5554_vm1, %v5553_v6 }
 0x104   : > { %v5037_v7 = vpop.f32.mrf.mxu0 }
 0x105   : > { %v5789_v11 = vadd.f32 %v5037_v7, %v4763_v8 }
 0x106   : > { %v601_v9 = vpop.f32.mrf.mxu0 }
 0x107   : > { %v5785_v10 = vadd.f32 %v4763_v8, %v601_v9 }
 0x109   : > { %611 = vrot.lane.b32.xlu0 %v5785_v10, %s5555_s28 }
 0x10d   : > { %689 = vrot.lane.b32.xlu0 %v5789_v11, %s5555_s28 }
 0x17b   : > { %v612_v12 = vpop.permute.xlu0 %611 }
 0x17c   : > { %5039 = vmatpush3.xpose.msk.msra.mxu0 %vm613_vm2, %v612_v12 }
 0x17d   : > { %5048 = vmatprep.subr.mxu0 %v5553_v6 }
 0x17f   : > { %5041 = vmatmul.mubr.msk.f32.vlgmr.msra.gmra.mxu0 %vm613_vm2, %v5785_v10  ;;  %v690_v13 = vpop.permute.xlu0 %689 }
 0x180   : > { %5044 = vmatpush3.xpose.msk.msra.mxu1 %vm613_vm2, %v690_v13  ;;  %5050 = vmatprep.mubr.msk.f32.mxu0 %vm5554_vm1, %v5553_v6 }
 0x181   : > { %5053 = vmatprep.subr.mxu1 %v5553_v6 }
 0x183   : > { %5046 = vmatmul.mubr.msk.f32.vlgmr.msra.gmra.mxu1 %vm613_vm2, %v5789_v11 }
 0x184   : > { %5055 = vmatprep.mubr.msk.f32.mxu1 %vm5554_vm1, %v5553_v6 }
 0x23f   : > { %v684_v14 = vpop.f32.mrf.mxu0 }
 0x240   : > { %v765_v15 = vmul.f32 0.35355338, %v684_v14 }
 0x241   : > { %v5042_v16 = vpop.f32.mrf.mxu0 }
 0x242   : > { %v767_v17 = vsel %vm613_vm2, %v765_v15, -inf }
 0x243   : > { %768 = vmax.xlane.f32.xlu1 %v767_v17  ;;  %v761_v18 = vpop.f32.mrf.mxu1 }
 0x244   : > { %v766_v19 = vmul.f32 0.35355338, %v761_v18 }
 0x245   : > { %v5047_v20 = vpop.f32.mrf.mxu1 }
 0x246   : > { %v770_v21 = vsel %vm613_vm2, %v766_v19, -inf }
 0x247   : > { %771 = vmax.xlane.f32.xlu1 %v770_v21 }
 0x2cc   : > { %v769_v22 = vpop.xlane.xlu1 %768 }
 0x2cd   : > { %v773_v23 = vsub.f32 %v765_v15, %v769_v22 }
 0x2cf   : > { %v775_v24 = vmul.f32 1.442695, %v773_v23 }
 0x2d0   : > { %v772_v25 = vpop.xlane.xlu1 %771 }
 0x2d1   : > { %5372 = vpow2.f32 %v775_v24  ;;  %v774_v26 = vsub.f32 %v766_v19, %v772_v25  ;;  %v4778_v19 = vld [vmem:[%s6350_s3 + $0x8] sm:$0xff] }
 0x2d3   : > { %v777_v27 = vmul.f32 1.442695, %v774_v26 }
 0x2d5   : > { %5374 = vpow2.f32 %v777_v27 }
 0x2de   : > { %v5373_v28 = vpop.eup %5372 }
 0x2df   : > { %v779_v29 = vsel %vm613_vm2, %v5373_v28, 0.0 }
 0x2e0   : > { %780 = vadd.xlane.f32.xlu0 %v779_v29 }
 0x2e2   : > { %v5375_v30 = vpop.eup %5374 }
 0x2e3   : > { %v782_v31 = vsel %vm613_vm2, %v5375_v30, 0.0 }
 0x2e4   : > { %783 = vadd.xlane.f32.xlu1 %v782_v31 }
 0x2f5   : > { %789 = vrot.lane.b32.xlu1 %v5785_v10, %s5556_s26 }
 0x2f6   : > { %942 = vrot.lane.b32.xlu0 %v5785_v10, %s5557_s15 }
 0x2f9   : > { %865 = vrot.lane.b32.xlu1 %v5789_v11, %s5556_s26 }
 0x2fd   : > { %944 = vrot.lane.b32.xlu1 %v5785_v10, %s5558_s18 }
 0x301   : > { %1022 = vrot.lane.b32.xlu1 %v5789_v11, %s5558_s18 }
 0x305   : > { %1020 = vrot.lane.b32.xlu1 %v5789_v11, %s5557_s15 }
 0x369   : > { %v781_v32 = vpop.xlane.xlu0 %780 }
 0x36a   : > { %5376 = vrcp.f32 %v781_v32 }
 0x36d   : > { %v784_v33 = vpop.xlane.xlu1 %783  ;;  %v943_v41 = vpop.permute.xlu0 %942 }
 0x36e   : > { %5378 = vrcp.f32 %v784_v33 }
 0x371   : > { %v790_v34 = vpop.permute.xlu1 %789 }
 0x372   : > { %5049 = vmatpush3.msra.mxu0 %v790_v34 }
 0x373   : > { %5058 = vmatprep.subr.mxu0 %v5553_v6 }
 0x375   : > { %v866_v35 = vpop.permute.xlu1 %865 }
 0x376   : > { %5054 = vmatpush3.msra.mxu1 %v866_v35 }
 0x377   : > { %v5377_v36 = vpop.eup %5376  ;;  %5063 = vmatprep.subr.mxu1 %v5553_v6 }
 0x378   : > { %v787_v37 = vmul.f32 %v5377_v36, %v5373_v28 }
 0x379   : > { %v945_v38 = vpop.permute.xlu1 %944 }
 0x37a   : > { %5051 = vmatmul.mubr.msk.f32.vlgmr.msra.gmra.mxu0 %vm613_vm2, %v787_v37 }
 0x37b   : > { %v5379_v39 = vpop.eup %5378  ;;  %5059 = vmatpush3.xpose.msk.msra.mxu0 %vm613_vm2, %v945_v38  ;;  %5060 = vmatprep.mubr.msk.f32.mxu0 %vm5554_vm1, %v5553_v6 }
 0x37c   : > { %v788_v40 = vmul.f32 %v5379_v39, %v5375_v30  ;;  %5068 = vmatprep.subr.mxu0 %v5553_v6 }
 0x37d   : > { %v1023_v42 = vpop.permute.xlu1 %1022 }
 0x37e   : > { %5056 = vmatmul.mubr.msk.f32.vlgmr.msra.gmra.mxu1 %vm613_vm2, %v788_v40  ;;  %5061 = vmatmul.mubr.msk.f32.vlgmr.msra.gmra.mxu0 %vm613_vm2, %v943_v41 }
 0x37f   : > { %5064 = vmatpush3.xpose.msk.msra.mxu1 %vm613_vm2, %v1023_v42  ;;  %5065 = vmatprep.mubr.msk.f32.mxu1 %vm5554_vm1, %v5553_v6 }
 0x380   : > { %5073 = vmatprep.subr.mxu1 %v5553_v6  ;;  %5070 = vmatprep.mubr.msk.f32.mxu0 %vm5554_vm1, %v5553_v6 }
 0x381   : > { %v1021_v43 = vpop.permute.xlu1 %1020 }
 0x382   : > { %5066 = vmatmul.mubr.msk.f32.vlgmr.msra.gmra.mxu1 %vm613_vm2, %v1021_v43 }
 0x383   : > { %5075 = vmatprep.mubr.msk.f32.mxu1 %vm5554_vm1, %v5553_v6 }
 0x43a   : > { %v861_v44 = vpop.f32.mrf.mxu0 }
 0x43c   : > { %v5052_v45 = vpop.f32.mrf.mxu0 }
 0x43e   : > { %v937_v46 = vpop.f32.mrf.mxu1  ;;  %v1016_v47 = vpop.f32.mrf.mxu0 }
 0x43f   : > { %v1098_v48 = vmul.f32 0.35355338, %v1016_v47 }
 0x440   : > { %v5057_v49 = vpop.f32.mrf.mxu1  ;;  %v5062_v50 = vpop.f32.mrf.mxu0 }
 0x441   : > { %v1100_v51 = vsel %vm613_vm2, %v1098_v48, -inf }
 0x442   : > { %v1094_v52 = vpop.f32.mrf.mxu1  ;;  %1101 = vmax.xlane.f32.xlu1 %v1100_v51 }
 0x443   : > { %v1099_v53 = vmul.f32 0.35355338, %v1094_v52 }
 0x444   : > { %v5067_v54 = vpop.f32.mrf.mxu1 }
 0x445   : > { %v1103_v55 = vsel %vm613_vm2, %v1099_v53, -inf }
 0x446   : > { %1104 = vmax.xlane.f32.xlu0 %v1103_v55 }
 0x45c   : > { %1198 = vrot.lane.b32.xlu0 %v5789_v11, %s5559_s20 }
 0x460   : > { %1438 = vrot.lane.b32.xlu0 %v5785_v10, %s6382_s30 }
 0x4cb   : > { %v1102_v56 = vpop.xlane.xlu1 %1101 }
 0x4cc   : > { %v1106_v57 = vsub.f32 %v1098_v48, %v1102_v56 }
 0x4ce   : > { %v1108_v60 = vmul.f32 1.442695, %v1106_v57  ;;  %v4789_v57 = vld [vmem:[%s6350_s3 + $0x10] sm:$0xff] }
 0x4cf   : > { %v1105_v58 = vpop.xlane.xlu0 %1104 }
 0x4d0   : > { %v1107_v59 = vsub.f32 %v1099_v53, %v1105_v58 }
 0x4d2   : > { %v1110_v61 = vmul.f32 1.442695, %v1107_v59 }
 0x4d3   : > { %v1199_v62 = vpop.permute.xlu0 %1198 }
 0x4d4   : > { %5380 = vpow2.f32 %v1110_v61  ;;  %5074 = vmatpush3.msra.mxu1 %v1199_v62 }
 0x4d5   : > { %5382 = vpow2.f32 %v1108_v60  ;;  %5083 = vmatprep.subr.mxu1 %v941_v4 }
 0x4d7   : > { %v1439_v27 = vpop.permute.xlu0 %1438 }
 0x4e1   : > { %v5381_v63 = vpop.eup %5380 }
 0x4e2   : > { %v1115_v0 = vsel %vm613_vm2, %v5381_v63, 0.0  ;;  %v5383_v1 = vpop.eup %5382 }
 0x4e3   : > { %1116 = vadd.xlane.f32.xlu1 %v1115_v0  ;;  %v1112_v3 = vsel %vm613_vm2, %v5383_v1, 0.0 }
 0x4e7   : > { %1113 = vadd.xlane.f32.xlu1 %v1112_v3 }
 0x4f8   : > { %1122 = vrot.lane.b32.xlu1 %v5785_v10, %s5559_s20 }
 0x4fc   : > { %1440 = vrot.lane.b32.xlu1 %v5785_v10, %s6384_s17 }
 0x500   : > { %1518 = vrot.lane.b32.xlu1 %v5789_v11, %s6384_s17  ;;  %s6402_s17 = smov 48  }
 0x504   : > { %1516 = vrot.lane.b32.xlu1 %v5789_v11, %s6382_s30  ;;  %s6407_s30 = sld [smem:[#allocation12_spill]] }
 0x50a   : > { %p6410_p12 = scmp.ne.s32.totalorder %s6407_s30, 0 }
 0x56c   : > { %v1117_v7 = vpop.xlane.xlu1 %1116 }
 0x56d   : > { %5384 = vrcp.f32 %v1117_v7 }
 0x570   : > { %v1114_v8 = vpop.xlane.xlu1 %1113 }
 0x571   : > { %5386 = vrcp.f32 %v1114_v8 }
 0x574   : > { %v1123_v9 = vpop.permute.xlu1 %1122 }
 0x575   : > { %5069 = vmatpush3.msra.mxu0 %v1123_v9 }
 0x576   : > { %5078 = vmatprep.subr.mxu0 %v4778_v19 }
 0x578   : > { %v1441_v12 = vpop.permute.xlu1 %1440 }
 0x57a   : > { %v5385_v13 = vpop.eup %5384 }
 0x57b   : > { %v1121_v14 = vmul.f32 %v5385_v13, %v5381_v63 }
 0x57c   : > { %v1519_v16 = vpop.permute.xlu1 %1518 }
 0x57d   : > { %5076 = vmatmul.mubr.msk.f32.vlgmr.msra.gmra.mxu1 %vm613_vm2, %v1121_v14 }
 0x57e   : > { %v5387_v15 = vpop.eup %5386  ;;  %5085 = vmatprep.mubr.msk.f32.mxu1 %vm613_vm2, %v861_v44  ;;  %5084 = vmatpush3.msra.mxu1 %v941_v4 }
 0x57f   : > { %5093 = vmatprep.subr.mxu1 %v5553_v6  ;;  %v1120_v17 = vmul.f32 %v5387_v15, %v5383_v1 }
 0x580   : > { %v1517_v18 = vpop.permute.xlu1 %1516 }
 0x581   : > { %5071 = vmatmul.mubr.msk.f32.vlgmr.msra.gmra.mxu0 %vm613_vm2, %v1120_v17  ;;  %5086 = vmatmul.mubr.msk.f32.vlgmr.msra.gmra.mxu1 %vm613_vm2, %v937_v46 }
 0x582   : > { %5094 = vmatpush3.xpose.msk.msra.mxu1 %vm613_vm2, %v1519_v16  ;;  %5095 = vmatprep.mubr.msk.f32.mxu1 %vm5554_vm1, %v5553_v6 }
 0x583   : > { %5103 = vmatprep.subr.mxu1 %v5553_v6  ;;  %5079 = vmatpush3.msra.mxu0 %v4778_v19 }
 0x584   : > { %5088 = vmatprep.subr.mxu0 %v5553_v6 }
 0x585   : > { %5096 = vmatmul.mubr.msk.f32.vlgmr.msra.gmra.mxu1 %vm613_vm2, %v1517_v18 }
 0x586   : > { %5105 = vmatprep.mubr.msk.f32.mxu1 %vm5554_vm1, %v5553_v6 }
 0x63d   : > { %v1270_v20 = vpop.f32.mrf.mxu1 }
 0x63f   : > { %v5077_v21 = vpop.f32.mrf.mxu1 }
 0x641   : > { %v1194_v22 = vpop.f32.mrf.mxu0  ;;  %v5874_v23 = vpop.f32.mrf.mxu1 }
 0x642   : > { %5080 = vmatprep.mubr.msk.f32.mxu0 %vm613_vm2, %v1194_v22 }
 0x643   : > { %v5072_v24 = vpop.f32.mrf.mxu0  ;;  %5081 = vmatmul.mubr.msk.f32.vlgmr.msra.gmra.mxu0 %vm613_vm2, %v1270_v20  ;;  %v5878_v25 = vpop.f32.mrf.mxu1 }
 0x644   : > { %5089 = vmatpush3.xpose.msk.msra.mxu0 %vm613_vm2, %v1441_v12  ;;  %5090 = vmatprep.mubr.msk.f32.mxu0 %vm5554_vm1, %v5553_v6 }
 0x645   : > { %v1590_v26 = vpop.f32.mrf.mxu1  ;;  %5098 = vmatprep.subr.mxu0 %v5553_v6 }
 0x646   : > { %v1595_v28 = vmul.f32 0.35355338, %v1590_v26 }
 0x647   : > { %5091 = vmatmul.mubr.msk.f32.vlgmr.msra.gmra.mxu0 %vm613_vm2, %v1439_v27  ;;  %v5097_v29 = vpop.f32.mrf.mxu1 }
 0x648   : > { %v1599_v30 = vsel %vm613_vm2, %v1595_v28, -inf  ;;  %5100 = vmatprep.mubr.msk.f32.mxu0 %vm5554_vm1, %v5553_v6 }
 0x649   : > { %1600 = vmax.xlane.f32.xlu1 %v1599_v30 }
 0x65a   : > { %1618 = vrot.lane.b32.xlu1 %v5785_v10, %s6380_s27 }
 0x65e   : > { %1857 = vrot.lane.b32.xlu1 %v5785_v10, %s6378_s23 }
 0x662   : > { %1935 = vrot.lane.b32.xlu1 %v5789_v11, %s6378_s23  ;;  %s6409_s23 = sld [smem:[#allocation15_spill]] }
 0x666   : > { %1933 = vrot.lane.b32.xlu1 %v5789_v11, %s6376_s29 }
 0x6d2   : > { %v1601_v31 = vpop.xlane.xlu1 %1600 }
 0x6d3   : > { %v1603_v33 = vsub.f32 %v1595_v28, %v1601_v31 }
 0x6d5   : > { %v1606_v34 = vmul.f32 1.442695, %v1603_v33 }
 0x6d6   : > { %v1619_v32 = vpop.permute.xlu1 %1618 }
 0x6d7   : > { %5099 = vmatpush3.msra.mxu0 %v1619_v32  ;;  %5388 = vpow2.f32 %v1606_v34 }
 0x6d8   : > { %5108 = vmatprep.subr.mxu0 %v4789_v57 }
 0x6da   : > { %v1858_v53 = vpop.permute.xlu1 %1857 }
 0x6de   : > { %v1936_v0 = vpop.permute.xlu1 %1935 }
 0x6e2   : > { %v1934_v4 = vpop.permute.xlu1 %1933 }
 0x6e4   : > { %v5389_v41 = vpop.eup %5388 }
 0x6e5   : > { %v1611_v42 = vsel %vm613_vm2, %v5389_v41, 0.0 }
 0x703   : > { %v5896_v35 = vpop.f32.mrf.mxu0 }
 0x704   : > { %v1435_v14 = vadd.f32 %v5874_v23, %v5896_v35 }
 0x705   : > { %v5898_v36 = vpop.f32.mrf.mxu0 }
 0x706   : > { %v1430_v16 = vadd.f32 %v5878_v25, %v5898_v36 }
 0x707   : > { %v1512_v37 = vpop.f32.mrf.mxu0 }
 0x708   : > { %v1594_v38 = vmul.f32 0.35355338, %v1512_v37 }
 0x709   : > { %v5092_v39 = vpop.f32.mrf.mxu0 }
 0x70a   : > { %v1596_v40 = vsel %vm613_vm2, %v1594_v38, -inf }
 0x70b   : > { %1597 = vmax.xlane.f32.xlu0 %v1596_v40 }
 0x70f   : > { %1612 = vadd.xlane.f32.xlu0 %v1611_v42 }
 0x794   : > { %v1598_v43 = vpop.xlane.xlu0 %1597 }
 0x795   : > { %v1602_v44 = vsub.f32 %v1594_v38, %v1598_v43 }
 0x797   : > { %v1604_v45 = vmul.f32 1.442695, %v1602_v44 }
 0x798   : > { %v1613_v48 = vpop.xlane.xlu0 %1612 }
 0x799   : > { %5390 = vpow2.f32 %v1604_v45 }
 0x79a   : > { %5392 = vrcp.f32 %v1613_v48 }
 0x7a6   : > { %v5391_v46 = vpop.eup %5390 }
 0x7a7   : > { %v1608_v47 = vsel %vm613_vm2, %v5391_v46, 0.0  ;;  %v5393_v50 = vpop.eup %5392 }
 0x7a8   : > { %1609 = vadd.xlane.f32.xlu0 %v1608_v47  ;;  %v1617_v52 = vmul.f32 %v5393_v50, %v5389_v41  ;;  %v4801_v41 = vld [vmem:[%s6351_s4] ss:$0 sm:$0xff] }
 0x7be   : > { %1694 = vrot.lane.b32.xlu0 %v5789_v11, %s6380_s27  ;;  %s6405_s27 = smov 40  }
 0x7c2   : > { %1855 = vrot.lane.b32.xlu0 %v5785_v10, %s6376_s29 }
 0x831   : > { %v1610_v49 = vpop.xlane.xlu0 %1609 }
 0x832   : > { %5394 = vrcp.f32 %v1610_v49 }
 0x835   : > { %v1695_v51 = vpop.permute.xlu0 %1694 }
 0x836   : > { %5104 = vmatpush3.msra.mxu1 %v1695_v51 }
 0x837   : > { %5106 = vmatmul.mubr.msk.f32.vlgmr.msra.gmra.mxu1 %vm613_vm2, %v1617_v52  ;;  %5113 = vmatprep.subr.mxu1 %v5553_v6 }
 0x838   : > { %5114 = vmatpush3.xpose.msk.msra.mxu1 %vm613_vm2, %v1858_v53  ;;  %5115 = vmatprep.mubr.msk.f32.mxu1 %vm5554_vm1, %v5553_v6 }
 0x839   : > { %v1856_v54 = vpop.permute.xlu0 %1855  ;;  %5123 = vmatprep.subr.mxu1 %v5553_v6 }
 0x83b   : > { %5116 = vmatmul.mubr.msk.f32.vlgmr.msra.gmra.mxu1 %vm613_vm2, %v1856_v54 }
 0x83c   : > { %5125 = vmatprep.mubr.msk.f32.mxu1 %vm5554_vm1, %v5553_v6 }
 0x83f   : > { %v5395_v55 = vpop.eup %5394 }
 0x840   : > { %v1616_v56 = vmul.f32 %v5395_v55, %v5391_v46 }
 0x842   : > { %5101 = vmatmul.mubr.msk.f32.vlgmr.msra.gmra.mxu0 %vm613_vm2, %v1616_v56 }
 0x843   : > { %5109 = vmatpush3.msra.mxu0 %v4789_v57 }
 0x844   : > { %5118 = vmatprep.subr.mxu0 %v5553_v6 }
 0x8f7   : > { %v1766_v58 = vpop.f32.mrf.mxu1 }
 0x8f9   : > { %v5107_v59 = vpop.f32.mrf.mxu1 }
 0x8fb   : > { %v1929_v60 = vpop.f32.mrf.mxu1 }
 0x8fc   : > { %v2011_v61 = vmul.f32 0.35355338, %v1929_v60  ;;  %v2330_v60 = vld [vmem:[%s6352_s5 + $0x10] sm:$0xff] }
 0x8fd   : > { %v5117_v62 = vpop.f32.mrf.mxu1 }
 0x8fe   : > { %v2013_v63 = vsel %vm613_vm2, %v2011_v61, -inf  ;;  %v2328_v62 = vld [vmem:[%s6352_s5] sm:$0xff] }
 0x8ff   : > { %2014 = vmax.xlane.f32.xlu0 %v2013_v63  ;;  %v2429_v63 = vld [vmem:[%s6354_s7 + $0x38] sm:$0xff] }
 0x902   : > { %v1690_v1 = vpop.f32.mrf.mxu0 }
 0x903   : > { %5110 = vmatprep.mubr.msk.f32.mxu0 %vm613_vm2, %v1690_v1  ;;  %v2427_v1 = vld [vmem:[%s6354_s7 + $0x28] sm:$0xff] }
 0x904   : > { %v5102_v3 = vpop.f32.mrf.mxu0  ;;  %5111 = vmatmul.mubr.msk.f32.vlgmr.msra.gmra.mxu0 %vm613_vm2, %v1766_v58 }
 0x905   : > { %5119 = vmatpush3.xpose.msk.msra.mxu0 %vm613_vm2, %v1936_v0  ;;  %5120 = vmatprep.mubr.msk.f32.mxu0 %vm5554_vm1, %v5553_v6  ;;  %v2428_v0 = vld [vmem:[%s6354_s7 + $0x30] sm:$0xff]  ;;  %v2426_v3 = vld [vmem:[%s6354_s7 + $0x20] sm:$0xff] }
 0x906   : > { %5128 = vmatprep.subr.mxu0 %v5553_v6 }
 0x908   : > { %5121 = vmatmul.mubr.msk.f32.vlgmr.msra.gmra.mxu0 %vm613_vm2, %v1934_v4 }
 0x909   : > { %5130 = vmatprep.mubr.msk.f32.mxu0 %vm5554_vm1, %v5553_v6 }
 0x988   : > { %v2015_v7 = vpop.xlane.xlu0 %2014 }
 0x989   : > { %v2019_v8 = vsub.f32 %v2011_v61, %v2015_v7  ;;  %v2329_v61 = vld [vmem:[%s6352_s5 + $0x8] sm:$0xff] }
 0x98b   : > { %v2021_v9 = vmul.f32 1.442695, %v2019_v8 }
 0x98d   : > { %5396 = vpow2.f32 %v2021_v9 }
 0x99a   : > { %v5397_v12 = vpop.eup %5396 }
 0x99b   : > { %v2025_v13 = vsel %vm613_vm2, %v5397_v12, 0.0 }
 0x99c   : > { %2026 = vadd.xlane.f32.xlu0 %v2025_v13 }
 0x9c4   : > { %v5112_v15 = vpop.f32.mrf.mxu0 }
 0x9c5   : > { %v1854_v17 = vadd.f32 %v5112_v15, %v1435_v14  ;;  %v4802_v15 = vld [vmem:[%s6356_s9] ss:$0 sm:$0xff] }
 0x9c6   : > { %v1844_v18 = vpop.f32.mrf.mxu0 }
 0x9c7   : > { %v1853_v19 = vadd.f32 %v1844_v18, %v1430_v16 }
 0x9c8   : > { %v2007_v20 = vpop.f32.mrf.mxu0 }
 0x9c9   : > { %v2012_v21 = vmul.f32 0.35355338, %v2007_v20  ;;  %v4803_v20 = vld [vmem:[%s6357_s10] ss:$0 sm:$0xff] }
 0x9ca   : > { %v5122_v22 = vpop.f32.mrf.mxu0 }
 0x9cb   : > { %v2016_v24 = vsel %vm613_vm2, %v2012_v21, -inf }
 0x9cc   : > { %2017 = vmax.xlane.f32.xlu1 %v2016_v24 }
 0x9dd   : > { %2035 = vrot.lane.b32.xlu1 %v5785_v10, %s6374_s24  ;;  %v4798_v10 = vld [vmem:[%s6350_s3 + $0x18] sm:$0xff] }
 0xa25   : > { %v2027_v26 = vpop.xlane.xlu0 %2026 }
 0xa26   : > { %5398 = vrcp.f32 %v2027_v26  ;;  %v2425_v26 = vld [vmem:[%s6354_s7 + $0x18] sm:$0xff] }
 0xa33   : > { %v5399_v27 = vpop.eup %5398 }
 0xa34   : > { %v2033_v30 = vmul.f32 %v5399_v27, %v5397_v12  ;;  %v2423_v27 = vld [vmem:[%s6354_s7 + $0x8] sm:$0xff] }
 0xa55   : > { %v2018_v23 = vpop.xlane.xlu1 %2017 }
 0xa56   : > { %v2020_v28 = vsub.f32 %v2012_v21, %v2018_v23  ;;  %v2424_v23 = vld [vmem:[%s6354_s7 + $0x10] sm:$0xff] }
 0xa58   : > { %v2023_v29 = vmul.f32 1.442695, %v2020_v28  ;;  %v2422_v28 = vld [vmem:[%s6354_s7] sm:$0xff] }
 0xa59   : > { %v2036_v25 = vpop.permute.xlu1 %2035 }
 0xa5a   : > { %5400 = vpow2.f32 %v2023_v29  ;;  %5124 = vmatpush3.msra.mxu1 %v2036_v25  ;;  %v4804_v29 = vld [vmem:[%s6353_s6] ss:$0 sm:$0xff] }
 0xa5b   : > { %5126 = vmatmul.mubr.msk.f32.vlgmr.msra.gmra.mxu1 %vm613_vm2, %v2033_v30  ;;  %5133 = vmatprep.subr.mxu1 %v4798_v10 }
 0xa5c   : > { %5134 = vmatpush3.msra.mxu1 %v4798_v10 }
 0xa5d   : > { %5149 = vmatprep.subr.mxu1 %v2429_v63 }
 0xa67   : > { %v5401_v31 = vpop.eup %5400 }
 0xa68   : > { %v2028_v32 = vsel %vm613_vm2, %v5401_v31, 0.0 }
 0xa69   : > { %2029 = vadd.xlane.f32.xlu0 %v2028_v32 }
 0xa7f   : > { %2111 = vrot.lane.b32.xlu0 %v5789_v11, %s6374_s24 }
 0xaf2   : > { %v2030_v33 = vpop.xlane.xlu0 %2029 }
 0xaf3   : > { %5402 = vrcp.f32 %v2030_v33 }
 0xaf6   : > { %v2112_v34 = vpop.permute.xlu0 %2111 }
 0xaf7   : > { %5129 = vmatpush3.msra.mxu0 %v2112_v34  ;;  %v4807_v34 = vld [vmem:[%s6355_s8] ss:$0 sm:$0xff] }
 0xb00   : > { %v5403_v35 = vpop.eup %5402 }
 0xb01   : > { %v2034_v36 = vmul.f32 %v5403_v35, %v5401_v31 }
 0xb03   : > { %5131 = vmatmul.mubr.msk.f32.vlgmr.msra.gmra.mxu0 %vm613_vm2, %v2034_v36 }
 0xb1b   : > { %v2107_v37 = vpop.f32.mrf.mxu1 }
 0xb1c   : > { %5135 = vmatprep.mubr.msk.f32.mxu1 %vm613_vm2, %v2107_v37 }
 0xb1d   : > { %v5127_v38 = vpop.f32.mrf.mxu1 }
 0xbc3   : > { %v2183_v39 = vpop.f32.mrf.mxu0 }
 0xbc4   : > { %5136 = vmatmul.mubr.msk.f32.vlgmr.msra.gmra.mxu1 %vm613_vm2, %v2183_v39 }
 0xbc5   : > { %v5132_v11 = vpop.f32.mrf.mxu0  ;;  %5150 = vmatpush3.msra.mxu1 %v2429_v63 }
 0xbc6   : > { %5151 = vmatprep.subr.mxu1 %v2428_v0 }
 0xbc7   : > { %5152 = vmatpush3.msra.mxu1 %v2428_v0 }
 0xbc8   : > { %5153 = vmatprep.subr.mxu1 %v2427_v1 }
 0xbc9   : > { %5154 = vmatpush3.msra.mxu1 %v2427_v1 }
 0xbca   : > { %5155 = vmatprep.subr.mxu1 %v2426_v3 }
 0xbcb   : > { %5156 = vmatpush3.msra.mxu1 %v2426_v3  ;;  %v4811_v3 = vld [vmem:[%s6359_s12] ss:$0 sm:$0xff] }
 0xbcc   : > { %5157 = vmatprep.subr.mxu1 %v2425_v26 }
 0xbcd   : > { %5158 = vmatpush3.msra.mxu1 %v2425_v26 }
 0xbce   : > { %5159 = vmatprep.subr.mxu1 %v2424_v23 }
 0xbcf   : > { %5160 = vmatpush3.msra.mxu1 %v2424_v23 }
 0xbd0   : > { %5161 = vmatprep.subr.mxu1 %v2423_v27 }
 0xbd1   : > { %5162 = vmatpush3.msra.mxu1 %v2423_v27 }
 0xbd2   : > { %5163 = vmatprep.subr.mxu1 %v2422_v28 }
 0xbd3   : > { %5164 = vmatpush3.msra.mxu1 %v2422_v28 }
 0xbd4   : > { %5184 = vmatprep.subr.mxu1 %v5553_v6 }
 0xc84   : > { %v5137_v40 = vpop.f32.mrf.mxu1 }
 0xc85   : > { %v2271_v42 = vadd.f32 %v5137_v40, %v1854_v17 }
 0xc86   : > { %v2261_v43 = vpop.f32.mrf.mxu1 }
 0xc87   : > { %v2280_v44 = vadd.f32 %v4801_v41, %v2271_v42  ;;  %v2270_v45 = vadd.f32 %v2261_v43, %v1853_v19 }
 0xc89   : > { %v2279_v46 = vadd.f32 %v4801_v41, %v2270_v45  ;;  %v2282_v47 = vadd.f32 %v2280_v44, %v5772_v5 }
 0xc8b   : > { %v2288_v48 = vsel %vm528_vm0, %v2282_v47, 0.0  ;;  %v2281_v49 = vadd.f32 %v2279_v46, %v5762_v2  ;;  %v2331_v2 = vld [vmem:[%s6352_s5 + $0x18] sm:$0xff] }
 0xc8c   : > { %2289 = vadd.xlane.f32.xlu0 %v2288_v48  ;;  %5138 = vmatprep.subr.mxu0 %v2331_v2 }
 0xc8d   : > { %v2285_v50 = vsel %vm528_vm0, %v2281_v49, 0.0  ;;  %5139 = vmatpush3.msra.mxu0 %v2331_v2 }
 0xc8e   : > { %2286 = vadd.xlane.f32.xlu1 %v2285_v50  ;;  %5140 = vmatprep.subr.mxu0 %v2330_v60 }
 0xc8f   : > { %5141 = vmatpush3.msra.mxu0 %v2330_v60 }
 0xc90   : > { %5142 = vmatprep.subr.mxu0 %v2329_v61 }
 0xc91   : > { %5143 = vmatpush3.msra.mxu0 %v2329_v61  ;;  %v4810_v61 = vld [vmem:[%s6358_s11] ss:$0 sm:$0xff] }
 0xc92   : > { %5144 = vmatprep.subr.mxu0 %v2328_v62 }
 0xc93   : > { %5145 = vmatpush3.msra.mxu0 %v2328_v62 }
 0xd15   : > { %v2290_v51 = vpop.xlane.xlu0 %2289 }
 0xd16   : > { %v2293_v52 = vmul.f32 0.03125, %v2290_v51 }
 0xd17   : > { %v2287_v53 = vpop.xlane.xlu1 %2286 }
 0xd18   : > { %v2295_v54 = vsub.f32 %v2282_v47, %v2293_v52  ;;  %v2292_v55 = vmul.f32 0.03125, %v2287_v53  ;;  %v4815_v52 = vld [vmem:[%s6348_s1 + $0x38] sm:$0xff]  ;;  %v4814_v53 = vld [vmem:[%s6348_s1 + $0x30] sm:$0xff] }
 0xd19   : > { %5168 = vmatprep.subr.mxu0 %v4815_v52 }
 0xd1a   : > { %v2294_v56 = vsub.f32 %v2281_v49, %v2292_v55  ;;  %v2297_v57 = vmul.f32 %v2295_v54, %v2295_v54  ;;  %v4812_v55 = vld [vmem:[%s6348_s1 + $0x20] sm:$0xff] }
 0xd1c   : > { %v2301_v58 = vsel %vm528_vm0, %v2297_v57, 0.0  ;;  %v2296_v59 = vmul.f32 %v2294_v56, %v2294_v56 }
 0xd1d   : > { %2302 = vadd.xlane.f32.xlu0 %v2301_v58 }
 0xd1e   : > { %v2298_v5 = vsel %vm528_vm0, %v2296_v59, 0.0 }
 0xd1f   : > { %2299 = vadd.xlane.f32.xlu1 %v2298_v5 }
 0xda6   : > { %v2303_v4 = vpop.xlane.xlu0 %2302 }
 0xda7   : > { %v2305_v7 = vmul.f32 0.03125, %v2303_v4 }
 0xda8   : > { %v2300_v8 = vpop.xlane.xlu1 %2299 }
 0xda9   : > { %v2307_v9 = vadd.f32 1e-05, %v2305_v7  ;;  %v2304_v12 = vmul.f32 0.03125, %v2300_v8 }
 0xdab   : > { %5404 = vrsqrt.f32 %v2307_v9  ;;  %v2306_v13 = vadd.f32 1e-05, %v2304_v12  ;;  %v4817_v9 = vld [vmem:[%s6349_s2 + $0x1] ss:$0 sm:$0xff] }
 0xdad   : > { %5406 = vrsqrt.f32 %v2306_v13 }
 0xdb8   : > { %v5405_v14 = vpop.eup %5404 }
 0xdb9   : > { %v2311_v16 = vmul.f32 %v5405_v14, %v2295_v54  ;;  %v4813_v54 = vld [vmem:[%s6348_s1 + $0x28] sm:$0xff] }
 0xdba   : > { %v5407_v17 = vpop.eup %5406 }
 0xdbb   : > { %v2310_v18 = vmul.f32 %v5407_v17, %v2294_v56  ;;  %v2319_v19 = vmul.f32 %v4802_v15, %v2311_v16 }
 0xdbd   : > { %v2318_v21 = vmul.f32 %v4802_v15, %v2310_v18  ;;  %v2327_v24 = vadd.f32 %v4803_v20, %v2319_v19 }
 0xdbf   : > { %v2326_v22 = vadd.f32 %v4803_v20, %v2318_v21 }
 0xdc1   : > { %5146 = vmatprep.mubr.msk.f32.mxu0 %vm528_vm0, %v2326_v22 }
 0xdc2   : > { %5147 = vmatmul.mubr.msk.f32.vlgmr.msra.gmra.mxu0 %vm528_vm0, %v2327_v24 }
 0xdc3   : > { %5169 = vmatpush3.msra.mxu0 %v4815_v52 }
 0xdc4   : > { %5170 = vmatprep.subr.mxu0 %v4814_v53 }
 0xdc5   : > { %5171 = vmatpush3.msra.mxu0 %v4814_v53 }
 0xdc6   : > { %5172 = vmatprep.subr.mxu0 %v4813_v54 }
 0xdc7   : > { %5173 = vmatpush3.msra.mxu0 %v4813_v54 }
 0xdc8   : > { %5174 = vmatprep.subr.mxu0 %v4812_v55 }
 0xdc9   : > { %5175 = vmatpush3.msra.mxu0 %v4812_v55 }
 0xdca   : > { %5179 = vmatprep.subr.mxu0 %v5553_v6 }
 0xe82   : > { %v5148_v25 = vpop.f32.mrf.mxu0 }
 0xe83   : > { %v2417_v30 = vadd.f32 %v5148_v25, %v4804_v29 }
 0xe84   : > { %v2411_v31 = vpop.f32.mrf.mxu0 }
 0xe85   : > { %v2412_v32 = vadd.f32 %v4804_v29, %v2411_v31  ;;  %v2421_v33 = vmax.f32 %v2417_v30, 0.0 }
 0xe87   : > { %v2420_v10 = vmax.f32 %v2412_v32, 0.0 }
 0xe89   : > { %5165 = vmatprep.mubr.msk.f32.mxu1 %vm2437_vm3, %v2420_v10 }
 0xe8a   : > { %5166 = vmatmul.mubr.msk.f32.vlgmr.msra.gmra.mxu1 %vm2437_vm3, %v2421_v33 }
 0xe8b   : > { %5186 = vmatprep.mubr.msk.f32.mxu1 %vm5554_vm1, %v5553_v6 }
 0xf4a   : > { %v5167_v35 = vpop.f32.mrf.mxu1 }
 0xf4b   : > { %v2516_v36 = vadd.f32 %v5167_v35, %v4807_v34 }
 0xf4c   : > { %v2510_v37 = vpop.f32.mrf.mxu1 }
 0xf4d   : > { %v2511_v38 = vadd.f32 %v4807_v34, %v2510_v37  ;;  %v2520_v39 = vadd.f32 %v2516_v36, %v2327_v24 }
 0xf4f   : > { %v2526_v11 = vsel %vm528_vm0, %v2520_v39, 0.0  ;;  %v2519_v40 = vadd.f32 %v2511_v38, %v2326_v22 }
 0xf50   : > { %2527 = vadd.xlane.f32.xlu0 %v2526_v11 }
 0xf51   : > { %v2523_v41 = vsel %vm528_vm0, %v2519_v40, 0.0 }
 0xf52   : > { %2524 = vadd.xlane.f32.xlu1 %v2523_v41 }
 0xfd9   : > { %v2528_v42 = vpop.xlane.xlu0 %2527 }
 0xfda   : > { %v2530_v43 = vmul.f32 0.03125, %v2528_v42 }
 0xfdb   : > { %v2525_v44 = vpop.xlane.xlu1 %2524 }
 0xfdc   : > { %v2532_v45 = vsub.f32 %v2520_v39, %v2530_v43  ;;  %v2529_v46 = vmul.f32 0.03125, %v2525_v44 }
 0xfde   : > { %v2531_v47 = vsub.f32 %v2519_v40, %v2529_v46  ;;  %v2534_v48 = vmul.f32 %v2532_v45, %v2532_v45 }
 0xfe0   : > { %v2538_v49 = vsel %vm528_vm0, %v2534_v48, 0.0  ;;  %v2533_v50 = vmul.f32 %v2531_v47, %v2531_v47 }
 0xfe1   : > { %2539 = vadd.xlane.f32.xlu0 %v2538_v49 }
 0xfe2   : > { %v2535_v51 = vsel %vm528_vm0, %v2533_v50, 0.0 }
 0xfe3   : > { %2536 = vadd.xlane.f32.xlu1 %v2535_v51 }
0x106a   : > { %v2540_v56 = vpop.xlane.xlu0 %2539 }
0x106b   : > { %v2542_v57 = vmul.f32 0.03125, %v2540_v56 }
0x106c   : > { %v2537_v58 = vpop.xlane.xlu1 %2536 }
0x106d   : > { %v2544_v59 = vadd.f32 1e-05, %v2542_v57  ;;  %v2541_v5 = vmul.f32 0.03125, %v2537_v58 }
0x106f   : > { %5408 = vrsqrt.f32 %v2544_v59  ;;  %v2543_v2 = vadd.f32 1e-05, %v2541_v5 }
0x1071   : > { %5410 = vrsqrt.f32 %v2543_v2 }
0x107c   : > { %v5409_v60 = vpop.eup %5408 }
0x107d   : > { %v2548_v62 = vmul.f32 %v5409_v60, %v2532_v45 }
0x107e   : > { %v5411_v63 = vpop.eup %5410 }
0x107f   : > { %v2547_v0 = vmul.f32 %v5411_v63, %v2531_v47  ;;  %v2556_v1 = vmul.f32 %v4810_v61, %v2548_v62 }
0x1081   : > { %v2555_v4 = vmul.f32 %v4810_v61, %v2547_v0  ;;  %v6038_v8 = vadd.f32 %v4811_v3, %v2556_v1 }
0x1083   : > { %v6036_v7 = vadd.f32 %v4811_v3, %v2555_v4 }
0x1085   : > { %5176 = vmatprep.mubr.msk.f32.mxu0 %vm528_vm0, %v6036_v7 }
0x1086   : > { %5177 = vmatmul.mubr.msk.f32.vlgmr.msra.gmra.mxu0 %vm528_vm0, %v6038_v8 }
0x1087   : > { %5181 = vmatprep.mubr.msk.f32.mxu0 %vm5554_vm1, %v5553_v6 }
0x1146   : > { %v5178_v12 = vpop.f32.mrf.mxu0 }
0x1147   : > { %v6049_v13 = vadd.f32 %v5178_v12, %v4817_v9  ;;  %v4826_v12 = vld [vmem:[%s6350_s3 + $0x20] sm:$0xff] }
0x1148   : > { %v2650_v14 = vpop.f32.mrf.mxu0 }
0x1149   : > { %v6051_v15 = vadd.f32 %v4817_v9, %v2650_v14  ;;  %2737 = vrot.lane.b32.xlu0 %v6049_v13, %s5555_s28 }
0x114b   : > { %2660 = vrot.lane.b32.xlu1 %v6051_v15, %s5555_s28  ;;  %s6400_s28 = smov 80  }
0x11bb   : > { %v2738_v16 = vpop.permute.xlu0 %2737 }
0x11bc   : > { %5185 = vmatpush3.xpose.msk.msra.mxu1 %vm613_vm2, %v2738_v16 }
0x11bd   : > { %v2661_v17 = vpop.permute.xlu1 %2660  ;;  %5194 = vmatprep.subr.mxu1 %v5553_v6 }
0x11be   : > { %5180 = vmatpush3.xpose.msk.msra.mxu0 %vm613_vm2, %v2661_v17 }
0x11bf   : > { %5187 = vmatmul.mubr.msk.f32.vlgmr.msra.gmra.mxu1 %vm613_vm2, %v6049_v13  ;;  %5189 = vmatprep.subr.mxu0 %v5553_v6 }
0x11c0   : > { %5196 = vmatprep.mubr.msk.f32.mxu1 %vm5554_vm1, %v5553_v6 }
0x11c1   : > { %5182 = vmatmul.mubr.msk.f32.vlgmr.msra.gmra.mxu0 %vm613_vm2, %v6051_v15 }
0x11c2   : > { %5191 = vmatprep.mubr.msk.f32.mxu0 %vm5554_vm1, %v5553_v6 }
0x127f   : > { %v2809_v18 = vpop.f32.mrf.mxu1 }
0x1280   : > { %v2814_v19 = vmul.f32 0.35355338, %v2809_v18 }
0x1281   : > { %v2732_v20 = vpop.f32.mrf.mxu0  ;;  %v5188_v21 = vpop.f32.mrf.mxu1 }
0x1282   : > { %v2813_v22 = vmul.f32 0.35355338, %v2732_v20  ;;  %v2818_v24 = vsel %vm613_vm2, %v2814_v19, -inf }
0x1283   : > { %2819 = vmax.xlane.f32.xlu0 %v2818_v24  ;;  %v5183_v26 = vpop.f32.mrf.mxu0  ;;  %v4833_v24 = vld [vmem:[%s6350_s3 + $0x28] sm:$0xff] }
0x1284   : > { %v2815_v23 = vsel %vm613_vm2, %v2813_v22, -inf }
0x1285   : > { %2816 = vmax.xlane.f32.xlu1 %v2815_v23 }
0x1296   : > { %2837 = vrot.lane.b32.xlu1 %v6051_v15, %s5556_s26 }
0x1299   : > { %2913 = vrot.lane.b32.xlu0 %v6049_v13, %s5556_s26  ;;  %s6401_s26 = smov 112  }
0x129a   : > { %2993 = vrot.lane.b32.xlu1 %v6051_v15, %s5558_s18 }
0x129e   : > { %3071 = vrot.lane.b32.xlu1 %v6049_v13, %s5558_s18 }
0x130c   : > { %v2820_v27 = vpop.xlane.xlu0 %2819 }
0x130d   : > { %v2822_v28 = vsub.f32 %v2814_v19, %v2820_v27 }
0x130e   : > { %v2817_v29 = vpop.xlane.xlu1 %2816 }
0x130f   : > { %v2825_v25 = vmul.f32 1.442695, %v2822_v28  ;;  %v2821_v30 = vsub.f32 %v2813_v22, %v2817_v29 }
0x1310   : > { %v2914_v31 = vpop.permute.xlu0 %2913 }
0x1311   : > { %5412 = vpow2.f32 %v2825_v25  ;;  %v2823_v32 = vmul.f32 1.442695, %v2821_v30  ;;  %5195 = vmatpush3.msra.mxu1 %v2914_v31 }
0x1312   : > { %v2838_v10 = vpop.permute.xlu1 %2837  ;;  %5204 = vmatprep.subr.mxu1 %v5553_v6 }
0x1313   : > { %5414 = vpow2.f32 %v2823_v32  ;;  %5190 = vmatpush3.msra.mxu0 %v2838_v10 }
0x1314   : > { %5199 = vmatprep.subr.mxu0 %v5553_v6 }
0x1316   : > { %v2994_v37 = vpop.permute.xlu1 %2993 }
0x131a   : > { %v3072_v38 = vpop.permute.xlu1 %3071 }
0x131e   : > { %v5413_v33 = vpop.eup %5412 }
0x131f   : > { %v2830_v34 = vsel %vm613_vm2, %v5413_v33, 0.0 }
0x1320   : > { %v5415_v35 = vpop.eup %5414  ;;  %2831 = vadd.xlane.f32.xlu0 %v2830_v34 }
0x1321   : > { %v2827_v36 = vsel %vm613_vm2, %v5415_v35, 0.0 }
0x1322   : > { %2828 = vadd.xlane.f32.xlu1 %v2827_v36 }
0x1333   : > { %3069 = vrot.lane.b32.xlu1 %v6049_v13, %s5557_s15 }
0x1336   : > { %2991 = vrot.lane.b32.xlu0 %v6051_v15, %s5557_s15  ;;  %s5566_s15 = smov [#allocation5]  }
0x1337   : > { %s5488_s18 = sshll.u32 %s5566_s15, 4  ;;  %s5489_s18 = int_to_ptr.vmem [resolvable:$false] %s5488_s18 }
0x13a9   : > { %v2832_v39 = vpop.xlane.xlu0 %2831 }
0x13aa   : > { %5416 = vrcp.f32 %v2832_v39 }
0x13ab   : > { %v2829_v11 = vpop.xlane.xlu1 %2828 }
0x13ac   : > { %5418 = vrcp.f32 %v2829_v11 }
0x13ad   : > { %v2992_v45 = vpop.permute.xlu0 %2991 }
0x13af   : > { %v3070_v44 = vpop.permute.xlu1 %3069 }
0x13b7   : > { %v5417_v40 = vpop.eup %5416 }
0x13b8   : > { %v2836_v41 = vmul.f32 %v5417_v40, %v5413_v33 }
0x13b9   : > { %v5419_v42 = vpop.eup %5418 }
0x13ba   : > { %5197 = vmatmul.mubr.msk.f32.vlgmr.msra.gmra.mxu1 %vm613_vm2, %v2836_v41  ;;  %v2835_v43 = vmul.f32 %v5419_v42, %v5415_v35 }
0x13bb   : > { %5205 = vmatpush3.xpose.msk.msra.mxu1 %vm613_vm2, %v3072_v38  ;;  %5206 = vmatprep.mubr.msk.f32.mxu1 %vm5554_vm1, %v5553_v6 }
0x13bc   : > { %5192 = vmatmul.mubr.msk.f32.vlgmr.msra.gmra.mxu0 %vm613_vm2, %v2835_v43  ;;  %5214 = vmatprep.subr.mxu1 %v5553_v6 }
0x13bd   : > { %5200 = vmatpush3.xpose.msk.msra.mxu0 %vm613_vm2, %v2994_v37  ;;  %5201 = vmatprep.mubr.msk.f32.mxu0 %vm5554_vm1, %v5553_v6 }
0x13be   : > { %5207 = vmatmul.mubr.msk.f32.vlgmr.msra.gmra.mxu1 %vm613_vm2, %v3070_v44  ;;  %5209 = vmatprep.subr.mxu0 %v5553_v6 }
0x13bf   : > { %5216 = vmatprep.mubr.msk.f32.mxu1 %vm5554_vm1, %v5553_v6 }
0x13c0   : > { %5202 = vmatmul.mubr.msk.f32.vlgmr.msra.gmra.mxu0 %vm613_vm2, %v2992_v45 }
0x13c1   : > { %5211 = vmatprep.mubr.msk.f32.mxu0 %vm5554_vm1, %v5553_v6 }
0x147a   : > { %v2985_v46 = vpop.f32.mrf.mxu1 }
0x147c   : > { %v2909_v47 = vpop.f32.mrf.mxu0  ;;  %v5198_v48 = vpop.f32.mrf.mxu1 }
0x147e   : > { %v5193_v49 = vpop.f32.mrf.mxu0  ;;  %v3143_v50 = vpop.f32.mrf.mxu1 }
0x147f   : > { %v3148_v51 = vmul.f32 0.35355338, %v3143_v50 }
0x1480   : > { %v3065_v52 = vpop.f32.mrf.mxu0  ;;  %v5208_v53 = vpop.f32.mrf.mxu1 }
0x1481   : > { %v3147_v54 = vmul.f32 0.35355338, %v3065_v52  ;;  %v3152_v55 = vsel %vm613_vm2, %v3148_v51, -inf }
0x1482   : > { %3153 = vmax.xlane.f32.xlu1 %v3152_v55  ;;  %v5203_v56 = vpop.f32.mrf.mxu0 }
0x1483   : > { %v3149_v57 = vsel %vm613_vm2, %v3147_v54, -inf }
0x1484   : > { %3150 = vmax.xlane.f32.xlu0 %v3149_v57 }
0x1493   : > { %3171 = vrot.lane.b32.xlu1 %v6051_v15, %s5559_s20 }
0x1497   : > { %3489 = vrot.lane.b32.xlu1 %v6051_v15, %s6400_s28 }
0x149b   : > { %3567 = vrot.lane.b32.xlu1 %v6049_v13, %s6400_s28 }
0x149f   : > { %3565 = vrot.lane.b32.xlu1 %v6049_v13, %s6401_s26 }
0x150b   : > { %v3154_v58 = vpop.xlane.xlu1 %3153 }
0x150c   : > { %v3156_v59 = vsub.f32 %v3148_v51, %v3154_v58 }
0x150d   : > { %v3151_v5 = vpop.xlane.xlu0 %3150 }
0x150e   : > { %v3159_v2 = vmul.f32 1.442695, %v3156_v59  ;;  %v3155_v60 = vsub.f32 %v3147_v54, %v3151_v5  ;;  %v4844_v59 = vld [vmem:[%s6350_s3 + $0x30] sm:$0xff] }
0x150f   : > { %v3172_v61 = vpop.permute.xlu1 %3171 }
0x1510   : > { %5420 = vpow2.f32 %v3159_v2  ;;  %v3157_v62 = vmul.f32 1.442695, %v3155_v60  ;;  %5210 = vmatpush3.msra.mxu0 %v3172_v61 }
0x1511   : > { %5219 = vmatprep.subr.mxu0 %v4833_v24 }
0x1512   : > { %5422 = vpow2.f32 %v3157_v62 }
0x1513   : > { %v3490_v16 = vpop.permute.xlu1 %3489 }
0x1517   : > { %v3568_v20 = vpop.permute.xlu1 %3567 }
0x151b   : > { %v3566_v22 = vpop.permute.xlu1 %3565 }
0x151d   : > { %v5421_v63 = vpop.eup %5420 }
0x151e   : > { %v3164_v0 = vsel %vm613_vm2, %v5421_v63, 0.0 }
0x151f   : > { %v5423_v1 = vpop.eup %5422  ;;  %3165 = vadd.xlane.f32.xlu0 %v3164_v0 }
0x1520   : > { %v3161_v3 = vsel %vm613_vm2, %v5423_v1, 0.0 }
0x1523   : > { %3162 = vadd.xlane.f32.xlu0 %v3161_v3 }
0x1539   : > { %3247 = vrot.lane.b32.xlu0 %v6049_v13, %s5559_s20  ;;  %s6406_s20 = sld [smem:[#allocation14_spill]] }
0x153d   : > { %3487 = vrot.lane.b32.xlu0 %v6051_v15, %s6401_s26 }
0x15a8   : > { %v3166_v4 = vpop.xlane.xlu0 %3165 }
0x15a9   : > { %5424 = vrcp.f32 %v3166_v4 }
0x15ac   : > { %v3163_v9 = vpop.xlane.xlu0 %3162 }
0x15ad   : > { %5426 = vrcp.f32 %v3163_v9 }
0x15b0   : > { %v3248_v14 = vpop.permute.xlu0 %3247 }
0x15b1   : > { %5215 = vmatpush3.msra.mxu1 %v3248_v14 }
0x15b2   : > { %5224 = vmatprep.subr.mxu1 %v4826_v12 }
0x15b4   : > { %v3488_v31 = vpop.permute.xlu0 %3487 }
0x15b6   : > { %v5425_v17 = vpop.eup %5424 }
0x15b7   : > { %v3170_v18 = vmul.f32 %v5425_v17, %v5421_v63 }
0x15b9   : > { %5217 = vmatmul.mubr.msk.f32.vlgmr.msra.gmra.mxu1 %vm613_vm2, %v3170_v18 }
0x15ba   : > { %v5427_v19 = vpop.eup %5426  ;;  %5226 = vmatprep.mubr.msk.f32.mxu1 %vm613_vm2, %v2909_v47  ;;  %5225 = vmatpush3.msra.mxu1 %v4826_v12 }
0x15bb   : > { %5234 = vmatprep.subr.mxu1 %v5553_v6  ;;  %v3169_v21 = vmul.f32 %v5427_v19, %v5423_v1 }
0x15bd   : > { %5212 = vmatmul.mubr.msk.f32.vlgmr.msra.gmra.mxu0 %vm613_vm2, %v3169_v21  ;;  %5227 = vmatmul.mubr.msk.f32.vlgmr.msra.gmra.mxu1 %vm613_vm2, %v2985_v46 }
0x15be   : > { %5235 = vmatpush3.xpose.msk.msra.mxu1 %vm613_vm2, %v3568_v20  ;;  %5236 = vmatprep.mubr.msk.f32.mxu1 %vm5554_vm1, %v5553_v6 }
0x15bf   : > { %5244 = vmatprep.subr.mxu1 %v5553_v6  ;;  %5220 = vmatpush3.msra.mxu0 %v4833_v24 }
0x15c0   : > { %5229 = vmatprep.subr.mxu0 %v5553_v6 }
0x15c1   : > { %5237 = vmatmul.mubr.msk.f32.vlgmr.msra.gmra.mxu1 %vm613_vm2, %v3566_v22 }
0x15c2   : > { %5246 = vmatprep.mubr.msk.f32.mxu1 %vm5554_vm1, %v5553_v6 }
0x1679   : > { %v3319_v26 = vpop.f32.mrf.mxu1 }
0x167b   : > { %v5218_v23 = vpop.f32.mrf.mxu1 }
0x167d   : > { %v3243_v27 = vpop.f32.mrf.mxu0  ;;  %v6138_v28 = vpop.f32.mrf.mxu1 }
0x167e   : > { %5221 = vmatprep.mubr.msk.f32.mxu0 %vm613_vm2, %v3243_v27 }
0x167f   : > { %v5213_v29 = vpop.f32.mrf.mxu0  ;;  %5222 = vmatmul.mubr.msk.f32.vlgmr.msra.gmra.mxu0 %vm613_vm2, %v3319_v26  ;;  %v6142_v25 = vpop.f32.mrf.mxu1 }
0x1680   : > { %5230 = vmatpush3.xpose.msk.msra.mxu0 %vm613_vm2, %v3490_v16  ;;  %5231 = vmatprep.mubr.msk.f32.mxu0 %vm5554_vm1, %v5553_v6 }
0x1681   : > { %v3639_v30 = vpop.f32.mrf.mxu1  ;;  %5239 = vmatprep.subr.mxu0 %v5553_v6 }
0x1682   : > { %v3644_v32 = vmul.f32 0.35355338, %v3639_v30 }
0x1683   : > { %5232 = vmatmul.mubr.msk.f32.vlgmr.msra.gmra.mxu0 %vm613_vm2, %v3488_v31  ;;  %v5238_v10 = vpop.f32.mrf.mxu1 }
0x1684   : > { %v3648_v33 = vsel %vm613_vm2, %v3644_v32, -inf  ;;  %5241 = vmatprep.mubr.msk.f32.mxu0 %vm5554_vm1, %v5553_v6 }
0x1685   : > { %3649 = vmax.xlane.f32.xlu1 %v3648_v33 }
0x1696   : > { %3667 = vrot.lane.b32.xlu1 %v6051_v15, %s6402_s17 }
0x169a   : > { %3906 = vrot.lane.b32.xlu1 %v6051_v15, %s6403_s25 }
0x169e   : > { %3984 = vrot.lane.b32.xlu1 %v6049_v13, %s6403_s25  ;;  %s6408_s25 = sshll.u32 %s5746_s14, 4 }
0x16a2   : > { %3982 = vrot.lane.b32.xlu1 %v6049_v13, %s6404_s16 }
0x170e   : > { %v3650_v34 = vpop.xlane.xlu1 %3649 }
0x170f   : > { %v3652_v36 = vsub.f32 %v3644_v32, %v3650_v34 }
0x1711   : > { %v3655_v37 = vmul.f32 1.442695, %v3652_v36 }
0x1712   : > { %v3668_v35 = vpop.permute.xlu1 %3667 }
0x1713   : > { %5240 = vmatpush3.msra.mxu0 %v3668_v35  ;;  %5428 = vpow2.f32 %v3655_v37 }
0x1714   : > { %5249 = vmatprep.subr.mxu0 %v4844_v59 }
0x1716   : > { %v3907_v55 = vpop.permute.xlu1 %3906 }
0x171a   : > { %v3985_v0 = vpop.permute.xlu1 %3984 }
0x171e   : > { %v3983_v4 = vpop.permute.xlu1 %3982 }
0x1720   : > { %v5429_v43 = vpop.eup %5428 }
0x1721   : > { %v3660_v44 = vsel %vm613_vm2, %v5429_v43, 0.0 }
0x173f   : > { %v6160_v38 = vpop.f32.mrf.mxu0 }
0x1740   : > { %v3484_v18 = vadd.f32 %v6138_v28, %v6160_v38 }
0x1741   : > { %v6162_v39 = vpop.f32.mrf.mxu0 }
0x1742   : > { %v3479_v20 = vadd.f32 %v6142_v25, %v6162_v39 }
0x1743   : > { %v3561_v11 = vpop.f32.mrf.mxu0 }
0x1744   : > { %v3643_v40 = vmul.f32 0.35355338, %v3561_v11 }
0x1745   : > { %v5233_v41 = vpop.f32.mrf.mxu0 }
0x1746   : > { %v3645_v42 = vsel %vm613_vm2, %v3643_v40, -inf }
0x1747   : > { %3646 = vmax.xlane.f32.xlu0 %v3645_v42  ;;  %v4857_v42 = vld [vmem:[%s6351_s4 + $0x1] ss:$0 sm:$0xff] }
0x174b   : > { %3661 = vadd.xlane.f32.xlu0 %v3660_v44 }
0x17d0   : > { %v3647_v45 = vpop.xlane.xlu0 %3646 }
0x17d1   : > { %v3651_v46 = vsub.f32 %v3643_v40, %v3647_v45 }
0x17d3   : > { %v3653_v47 = vmul.f32 1.442695, %v3651_v46 }
0x17d4   : > { %v3662_v50 = vpop.xlane.xlu0 %3661 }
0x17d5   : > { %5430 = vpow2.f32 %v3653_v47 }
0x17d6   : > { %5432 = vrcp.f32 %v3662_v50 }
0x17e2   : > { %v5431_v48 = vpop.eup %5430 }
0x17e3   : > { %v3657_v49 = vsel %vm613_vm2, %v5431_v48, 0.0  ;;  %v5433_v52 = vpop.eup %5432 }
0x17e4   : > { %3658 = vadd.xlane.f32.xlu0 %v3657_v49  ;;  %v3666_v54 = vmul.f32 %v5433_v52, %v5429_v43 }
0x17fa   : > { %3743 = vrot.lane.b32.xlu0 %v6049_v13, %s6402_s17  ;;  %s4894_s17 = sshll.u32 %s5670_s22, 8  ;;  %s4668_s22 = scalar_lea.sflag [#allocation4], %s5746_s14 }
0x17fb   : > { %s6300_s28 = scalar_lea.hbm %s6409_s23, %s4894_s17 }
0x17fe   : > { %3904 = vrot.lane.b32.xlu0 %v6051_v15, %s6404_s16  ;;  %s512_s16 = scalar_lea.vmem [#allocation5], %s6408_s25 }
0x17ff   : > { %s4681_s29 = sshll.u32 %s512_s16, 4  ;;  %s6302_s29 = int_to_ptr.vmem [resolvable:$true] %s4681_s29 }
0x1800   : > { %s5484_s26 = scalar_lea.vmem %s6302_s29, 256  ;;  %p5491_p5 = scmp.lt.s32.totalorder %s6302_s29, %s5489_s18 }
0x1801   : > { %p5485_p11 = scmp.ne.s32.totalorder %s6302_s29, %s5484_s26 }
0x1803   : > { %p5486_p13 = pnand %p5485_p11, %p6410_p12 }
0x1805   : > { %p5487_p4 = pneg %p5486_p13 }
0x186d   : > { %v3659_v51 = vpop.xlane.xlu0 %3658 }
0x186e   : > { %5434 = vrcp.f32 %v3659_v51 }
0x1871   : > { %v3744_v53 = vpop.permute.xlu0 %3743 }
0x1872   : > { %5245 = vmatpush3.msra.mxu1 %v3744_v53 }
0x1873   : > { %5247 = vmatmul.mubr.msk.f32.vlgmr.msra.gmra.mxu1 %vm613_vm2, %v3666_v54  ;;  %5254 = vmatprep.subr.mxu1 %v5553_v6 }
0x1874   : > { %5255 = vmatpush3.xpose.msk.msra.mxu1 %vm613_vm2, %v3907_v55  ;;  %5256 = vmatprep.mubr.msk.f32.mxu1 %vm5554_vm1, %v5553_v6 }
0x1875   : > { %v3905_v56 = vpop.permute.xlu0 %3904  ;;  %5264 = vmatprep.subr.mxu1 %v5553_v6 }
0x1877   : > { %5257 = vmatmul.mubr.msk.f32.vlgmr.msra.gmra.mxu1 %vm613_vm2, %v3905_v56 }
0x1878   : > { %5266 = vmatprep.mubr.msk.f32.mxu1 %vm5554_vm1, %v5553_v6 }
0x187b   : > { %v5435_v57 = vpop.eup %5434 }
0x187c   : > { %v3665_v58 = vmul.f32 %v5435_v57, %v5431_v48 }
0x187e   : > { %5242 = vmatmul.mubr.msk.f32.vlgmr.msra.gmra.mxu0 %vm613_vm2, %v3665_v58 }
0x187f   : > { %5250 = vmatpush3.msra.mxu0 %v4844_v59 }
0x1880   : > { %5259 = vmatprep.subr.mxu0 %v5553_v6 }
0x1933   : > { %v3815_v5 = vpop.f32.mrf.mxu1 }
0x1935   : > { %v5248_v2 = vpop.f32.mrf.mxu1 }
0x1936   : > { %v4864_v2 = vld [vmem:[%s6352_s5 + $0x30] sm:$0xff] }
0x1937   : > { %v3978_v60 = vpop.f32.mrf.mxu1 }
0x1938   : > { %v4060_v61 = vmul.f32 0.35355338, %v3978_v60  ;;  %v4863_v60 = vld [vmem:[%s6352_s5 + $0x28] sm:$0xff] }
0x1939   : > { %v5258_v62 = vpop.f32.mrf.mxu1 }
0x193a   : > { %v4062_v63 = vsel %vm613_vm2, %v4060_v61, -inf  ;;  %v4877_v62 = vld [vmem:[%s6354_s7 + $0x78] sm:$0xff] }
0x193b   : > { %4063 = vmax.xlane.f32.xlu0 %v4062_v63  ;;  %v4876_v63 = vld [vmem:[%s6354_s7 + $0x70] sm:$0xff] }
0x193e   : > { %v3739_v1 = vpop.f32.mrf.mxu0 }
0x193f   : > { %5251 = vmatprep.mubr.msk.f32.mxu0 %vm613_vm2, %v3739_v1  ;;  %v4874_v1 = vld [vmem:[%s6354_s7 + $0x60] sm:$0xff] }
0x1940   : > { %v5243_v3 = vpop.f32.mrf.mxu0  ;;  %5252 = vmatmul.mubr.msk.f32.vlgmr.msra.gmra.mxu0 %vm613_vm2, %v3815_v5 }
0x1941   : > { %5260 = vmatpush3.xpose.msk.msra.mxu0 %vm613_vm2, %v3985_v0  ;;  %5261 = vmatprep.mubr.msk.f32.mxu0 %vm5554_vm1, %v5553_v6  ;;  %v4875_v0 = vld [vmem:[%s6354_s7 + $0x68] sm:$0xff] }
0x1942   : > { %5269 = vmatprep.subr.mxu0 %v5553_v6 }
0x1944   : > { %5262 = vmatmul.mubr.msk.f32.vlgmr.msra.gmra.mxu0 %vm613_vm2, %v3983_v4 }
0x1945   : > { %5271 = vmatprep.mubr.msk.f32.mxu0 %vm5554_vm1, %v5553_v6 }
0x19c4   : > { %v4064_v9 = vpop.xlane.xlu0 %4063 }
0x19c5   : > { %v4068_v12 = vsub.f32 %v4060_v61, %v4064_v9  ;;  %v4862_v61 = vld [vmem:[%s6352_s5 + $0x20] sm:$0xff] }
0x19c7   : > { %v4070_v14 = vmul.f32 1.442695, %v4068_v12 }
0x19c9   : > { %5436 = vpow2.f32 %v4070_v14 }
0x19d6   : > { %v5437_v16 = vpop.eup %5436 }
0x19d7   : > { %v4074_v17 = vsel %vm613_vm2, %v5437_v16, 0.0 }
0x19d8   : > { %4075 = vadd.xlane.f32.xlu0 %v4074_v17 }
0x1a00   : > { %v5253_v19 = vpop.f32.mrf.mxu0 }
0x1a01   : > { %v3903_v21 = vadd.f32 %v5253_v19, %v3484_v18  ;;  %v4860_v18 = vld [vmem:[%s6356_s9 + $0x1] ss:$0 sm:$0xff] }
0x1a02   : > { %v3893_v22 = vpop.f32.mrf.mxu0 }
0x1a03   : > { %v3902_v24 = vadd.f32 %v3893_v22, %v3479_v20 }
0x1a04   : > { %v4056_v26 = vpop.f32.mrf.mxu0 }
0x1a05   : > { %v4061_v6 = vmul.f32 0.35355338, %v4056_v26 }
0x1a06   : > { %v5263_v23 = vpop.f32.mrf.mxu0 }
0x1a07   : > { %v4065_v27 = vsel %vm613_vm2, %v4061_v6, -inf }
0x1a08   : > { %4066 = vmax.xlane.f32.xlu1 %v4065_v27  ;;  %v4873_v27 = vld [vmem:[%s6354_s7 + $0x58] sm:$0xff] }
0x1a19   : > { %4084 = vrot.lane.b32.xlu1 %v6051_v15, %s6405_s27  ;;  %v4853_v15 = vld [vmem:[%s6350_s3 + $0x38] sm:$0xff] }
0x1a61   : > { %v4076_v29 = vpop.xlane.xlu0 %4075 }
0x1a62   : > { %5438 = vrcp.f32 %v4076_v29  ;;  %v4872_v29 = vld [vmem:[%s6354_s7 + $0x50] sm:$0xff] }
0x1a6f   : > { %v5439_v28 = vpop.eup %5438 }
0x1a70   : > { %v4082_v25 = vmul.f32 %v5439_v28, %v5437_v16  ;;  %v4870_v28 = vld [vmem:[%s6354_s7 + $0x40] sm:$0xff] }
0x1a91   : > { %v4067_v30 = vpop.xlane.xlu1 %4066 }
0x1a92   : > { %v4069_v31 = vsub.f32 %v4061_v6, %v4067_v30  ;;  %v4871_v30 = vld [vmem:[%s6354_s7 + $0x48] sm:$0xff] }
0x1a94   : > { %v4072_v32 = vmul.f32 1.442695, %v4069_v31  ;;  %v4867_v31 = vld [vmem:[%s6353_s6 + $0x1] ss:$0 sm:$0xff] }
0x1a95   : > { %v4085_v10 = vpop.permute.xlu1 %4084 }
0x1a96   : > { %5440 = vpow2.f32 %v4072_v32  ;;  %5265 = vmatpush3.msra.mxu1 %v4085_v10 }
0x1a97   : > { %5267 = vmatmul.mubr.msk.f32.vlgmr.msra.gmra.mxu1 %vm613_vm2, %v4082_v25  ;;  %5274 = vmatprep.subr.mxu1 %v4853_v15 }
0x1a98   : > { %5275 = vmatpush3.msra.mxu1 %v4853_v15 }
0x1a99   : > { %5290 = vmatprep.subr.mxu1 %v4877_v62 }
0x1aa3   : > { %v5441_v33 = vpop.eup %5440 }
0x1aa4   : > { %v4077_v34 = vsel %vm613_vm2, %v5441_v33, 0.0 }
0x1aa5   : > { %4078 = vadd.xlane.f32.xlu0 %v4077_v34 }
0x1abb   : > { %4160 = vrot.lane.b32.xlu0 %v6049_v13, %s6405_s27 }
0x1b2e   : > { %v4079_v35 = vpop.xlane.xlu0 %4078 }
0x1b2f   : > { %5442 = vrcp.f32 %v4079_v35  ;;  %v4879_v35 = vld [vmem:[%s6355_s8 + $0x1] ss:$0 sm:$0xff] }
0x1b32   : > { %v4161_v36 = vpop.permute.xlu0 %4160 }
0x1b33   : > { %5270 = vmatpush3.msra.mxu0 %v4161_v36 }
0x1b3c   : > { %v5443_v37 = vpop.eup %5442 }
0x1b3d   : > { %v4083_v38 = vmul.f32 %v5443_v37, %v5441_v33 }
0x1b3f   : > { %5272 = vmatmul.mubr.msk.f32.vlgmr.msra.gmra.mxu0 %vm613_vm2, %v4083_v38 }
0x1b57   : > { %v4156_v39 = vpop.f32.mrf.mxu1 }
0x1b58   : > { %5276 = vmatprep.mubr.msk.f32.mxu1 %vm613_vm2, %v4156_v39 }
0x1b59   : > { %v5268_v11 = vpop.f32.mrf.mxu1 }
0x1bff   : > { %v4232_v40 = vpop.f32.mrf.mxu0 }
0x1c00   : > { %5277 = vmatmul.mubr.msk.f32.vlgmr.msra.gmra.mxu1 %vm613_vm2, %v4232_v40 }
0x1c01   : > { %v5273_v13 = vpop.f32.mrf.mxu0  ;;  %5291 = vmatpush3.msra.mxu1 %v4877_v62 }
0x1c02   : > { %5292 = vmatprep.subr.mxu1 %v4876_v63 }
0x1c03   : > { %5293 = vmatpush3.msra.mxu1 %v4876_v63 }
0x1c04   : > { %5294 = vmatprep.subr.mxu1 %v4875_v0 }
0x1c05   : > { %5295 = vmatpush3.msra.mxu1 %v4875_v0 }
0x1c06   : > { %5296 = vmatprep.subr.mxu1 %v4874_v1 }
0x1c07   : > { %5297 = vmatpush3.msra.mxu1 %v4874_v1 }
0x1c08   : > { %5298 = vmatprep.subr.mxu1 %v4873_v27 }
0x1c09   : > { %5299 = vmatpush3.msra.mxu1 %v4873_v27 }
0x1c0a   : > { %5300 = vmatprep.subr.mxu1 %v4872_v29 }
0x1c0b   : > { %5301 = vmatpush3.msra.mxu1 %v4872_v29  ;;  %v4886_v29 = vld [vmem:[%s6360_s13] ss:$0 sm:$0xff] }
0x1c0c   : > { %5302 = vmatprep.subr.mxu1 %v4871_v30 }
0x1c0d   : > { %5303 = vmatpush3.msra.mxu1 %v4871_v30 }
0x1c0e   : > { %5304 = vmatprep.subr.mxu1 %v4870_v28 }
0x1c0f   : > { %5305 = vmatpush3.msra.mxu1 %v4870_v28 }
0x1cc0   : > { %v5278_v41 = vpop.f32.mrf.mxu1 }
0x1cc1   : > { %v4320_v43 = vadd.f32 %v5278_v41, %v3903_v21 }
0x1cc2   : > { %v4310_v44 = vpop.f32.mrf.mxu1 }
0x1cc3   : > { %v4330_v45 = vadd.f32 %v4857_v42, %v4320_v43  ;;  %v4319_v46 = vadd.f32 %v4310_v44, %v3902_v24  ;;  %v4861_v24 = vld [vmem:[%s6357_s10 + $0x1] ss:$0 sm:$0xff] }
0x1cc5   : > { %v4329_v47 = vadd.f32 %v4857_v42, %v4319_v46  ;;  %v4332_v48 = vadd.f32 %v4330_v45, %v6038_v8 }
0x1cc7   : > { %v4340_v49 = vsel %vm528_vm0, %v4332_v48, 0.0  ;;  %v4331_v50 = vadd.f32 %v4329_v47, %v6036_v7  ;;  %v4865_v7 = vld [vmem:[%s6352_s5 + $0x38] sm:$0xff] }
0x1cc8   : > { %4341 = vadd.xlane.f32.xlu0 %v4340_v49  ;;  %5279 = vmatprep.subr.mxu0 %v4865_v7 }
0x1cc9   : > { %v4337_v51 = vsel %vm528_vm0, %v4331_v50, 0.0  ;;  %5280 = vmatpush3.msra.mxu0 %v4865_v7  ;;  %v4885_v7 = vld [vmem:[%s6359_s12 + $0x1] ss:$0 sm:$0xff] }
0x1cca   : > { %4338 = vadd.xlane.f32.xlu1 %v4337_v51  ;;  %5281 = vmatprep.subr.mxu0 %v4864_v2 }
0x1ccb   : > { %5282 = vmatpush3.msra.mxu0 %v4864_v2 }
0x1ccc   : > { %5283 = vmatprep.subr.mxu0 %v4863_v60 }
0x1ccd   : > { %5284 = vmatpush3.msra.mxu0 %v4863_v60 }
0x1cce   : > { %5285 = vmatprep.subr.mxu0 %v4862_v61 }
0x1ccf   : > { %5286 = vmatpush3.msra.mxu0 %v4862_v61 }
0x1d51   : > { %v4342_v52 = vpop.xlane.xlu0 %4341 }
0x1d52   : > { %v4344_v53 = vmul.f32 0.03125, %v4342_v52 }
0x1d53   : > { %v4339_v54 = vpop.xlane.xlu1 %4338 }
0x1d54   : > { %v4346_v55 = vsub.f32 %v4332_v48, %v4344_v53  ;;  %v4343_v56 = vmul.f32 0.03125, %v4339_v54 }
0x1d56   : > { %v4345_v57 = vsub.f32 %v4331_v50, %v4343_v56  ;;  %v4348_v58 = vmul.f32 %v4346_v55, %v4346_v55 }
0x1d58   : > { %v4352_v59 = vsel %vm528_vm0, %v4348_v58, 0.0  ;;  %v4347_v5 = vmul.f32 %v4345_v57, %v4345_v57 }
0x1d59   : > { %4353 = vadd.xlane.f32.xlu0 %v4352_v59  ;;  %v4884_v59 = vld [vmem:[%s6358_s11 + $0x1] ss:$0 sm:$0xff] }
0x1d5a   : > { %v4349_v8 = vsel %vm528_vm0, %v4347_v5, 0.0 }
0x1d5b   : > { %4350 = vadd.xlane.f32.xlu1 %v4349_v8 }
0x1de2   : > { %v4354_v3 = vpop.xlane.xlu0 %4353 }
0x1de3   : > { %v4356_v4 = vmul.f32 0.03125, %v4354_v3 }
0x1de4   : > { %v4351_v9 = vpop.xlane.xlu1 %4350 }
0x1de5   : > { %v4358_v12 = vadd.f32 1e-05, %v4356_v4  ;;  %v4355_v14 = vmul.f32 0.03125, %v4351_v9 }
0x1de7   : > { %5444 = vrsqrt.f32 %v4358_v12  ;;  %v4357_v16 = vadd.f32 1e-05, %v4355_v14 }
0x1de9   : > { %5446 = vrsqrt.f32 %v4357_v16 }
0x1df4   : > { %v5445_v17 = vpop.eup %5444 }
0x1df5   : > { %v4362_v19 = vmul.f32 %v5445_v17, %v4346_v55 }
0x1df6   : > { %v5447_v20 = vpop.eup %5446 }
0x1df7   : > { %v4361_v21 = vmul.f32 %v5447_v20, %v4345_v57  ;;  %v4370_v22 = vmul.f32 %v4860_v18, %v4362_v19 }
0x1df9   : > { %v4369_v26 = vmul.f32 %v4860_v18, %v4361_v21  ;;  %v4378_v23 = vadd.f32 %v4861_v24, %v4370_v22 }
0x1dfb   : > { %v4377_v6 = vadd.f32 %v4861_v24, %v4369_v26 }
0x1dfd   : > { %5287 = vmatprep.mubr.msk.f32.mxu0 %vm528_vm0, %v4377_v6 }
0x1dfe   : > { %5288 = vmatmul.mubr.msk.f32.vlgmr.msra.gmra.mxu0 %vm528_vm0, %v4378_v23 }
0x1ebe   : > { %v5289_v32 = vpop.f32.mrf.mxu0 }
0x1ebf   : > { %v4470_v10 = vadd.f32 %v5289_v32, %v4867_v31 }
0x1ec0   : > { %v4464_v25 = vpop.f32.mrf.mxu0 }
0x1ec1   : > { %v4465_v33 = vadd.f32 %v4867_v31, %v4464_v25  ;;  %v4474_v15 = vmax.f32 %v4470_v10, 0.0  ;;  %v4887_v31 = vld [vmem:[%s6406_s20] ss:$0 sm:$0xff]  ;;  %s5490_s20 = scalar_lea.vmem %s5489_s18, 512 }
0x1ec2   : > { %p5492_p7 = scmp.lt.s32.totalorder %s5490_s20, %s5484_s26 }
0x1ec3   : > { %v4473_v34 = vmax.f32 %v4465_v33, 0.0 }
0x1ec4   : > { %p5493_p8 = por %p5492_p7, %p5491_p5 }
0x1ec5   : > { %5306 = vmatprep.mubr.msk.f32.mxu1 %vm2437_vm3, %v4473_v34 }
0x1ec6   : > { %5307 = vmatmul.mubr.msk.f32.vlgmr.msra.gmra.mxu1 %vm2437_vm3, %v4474_v15  ;;  %p5494_p10 = pnand %p5493_p8, %p5487_p4 }
0x1f86   : > { %v5308_v36 = vpop.f32.mrf.mxu1 }
0x1f87   : > { %v4570_v37 = vadd.f32 %v5308_v36, %v4879_v35 }
0x1f88   : > { %v4564_v38 = vpop.f32.mrf.mxu1 }
0x1f89   : > { %v4565_v39 = vadd.f32 %v4879_v35, %v4564_v38  ;;  %v4574_v11 = vadd.f32 %v4570_v37, %v4378_v23 }
0x1f8b   : > { %v4582_v40 = vsel %vm528_vm0, %v4574_v11, 0.0  ;;  %v4573_v13 = vadd.f32 %v4565_v39, %v4377_v6 }
0x1f8c   : > { %4583 = vadd.xlane.f32.xlu0 %v4582_v40 }
0x1f8d   : > { %v4579_v41 = vsel %vm528_vm0, %v4573_v13, 0.0 }
0x1f8e   : > { %4580 = vadd.xlane.f32.xlu1 %v4579_v41 }
0x2015   : > { %v4584_v42 = vpop.xlane.xlu0 %4583 }
0x2016   : > { %v4586_v43 = vmul.f32 0.03125, %v4584_v42 }
0x2017   : > { %v4581_v44 = vpop.xlane.xlu1 %4580 }
0x2018   : > { %v4588_v45 = vsub.f32 %v4574_v11, %v4586_v43  ;;  %v4585_v46 = vmul.f32 0.03125, %v4581_v44 }
0x201a   : > { %v4587_v47 = vsub.f32 %v4573_v13, %v4585_v46  ;;  %v4590_v48 = vmul.f32 %v4588_v45, %v4588_v45 }
0x201c   : > { %v4594_v49 = vsel %vm528_vm0, %v4590_v48, 0.0  ;;  %v4589_v50 = vmul.f32 %v4587_v47, %v4587_v47 }
0x201d   : > { %4595 = vadd.xlane.f32.xlu0 %v4594_v49 }
0x201e   : > { %v4591_v51 = vsel %vm528_vm0, %v4589_v50, 0.0 }
0x201f   : > { %4592 = vadd.xlane.f32.xlu1 %v4591_v51 }
0x20a6   : > { %v4596_v52 = vpop.xlane.xlu0 %4595 }
0x20a7   : > { %v4598_v53 = vmul.f32 0.03125, %v4596_v52 }
0x20a8   : > { %v4593_v54 = vpop.xlane.xlu1 %4592 }
0x20a9   : > { %v4600_v55 = vadd.f32 1e-05, %v4598_v53  ;;  %v4597_v56 = vmul.f32 0.03125, %v4593_v54 }
0x20ab   : > { %5448 = vrsqrt.f32 %v4600_v55  ;;  %v4599_v57 = vadd.f32 1e-05, %v4597_v56 }
0x20ad   : > { %5450 = vrsqrt.f32 %v4599_v57 }
0x20b8   : > { %v5449_v58 = vpop.eup %5448 }
0x20b9   : > { %v4604_v5 = vmul.f32 %v5449_v58, %v4588_v45 }
0x20ba   : > { %v5451_v8 = vpop.eup %5450 }
0x20bb   : > { %v4612_v2 = vmul.f32 %v4884_v59, %v4604_v5  ;;  %v4603_v60 = vmul.f32 %v5451_v8, %v4587_v47 }
0x20bd   : > { %v4620_v61 = vadd.f32 %v4885_v7, %v4612_v2  ;;  %v4611_v62 = vmul.f32 %v4884_v59, %v4603_v60 }
0x20bf   : > { %v4626_v63 = vsel %vm528_vm0, %v4620_v61, 0.0  ;;  %v4619_v0 = vadd.f32 %v4885_v7, %v4611_v62 }
0x20c0   : > { %4627 = vadd.xlane.f32.xlu0 %v4626_v63 }
0x20c1   : > { %v4623_v1 = vsel %vm528_vm0, %v4619_v0, 0.0 }
0x20c2   : > { %4624 = vadd.xlane.f32.xlu1 %v4623_v1 }
0x2149   : > { %v4628_v3 = vpop.xlane.xlu0 %4627 }
0x214a   : > { %v4630_v4 = vmul.f32 0.03125, %v4628_v3 }
0x214b   : > { %v4625_v9 = vpop.xlane.xlu1 %4624 }
0x214c   : > { %v4632_v12 = vsub.f32 %v4620_v61, %v4630_v4  ;;  %v4629_v14 = vmul.f32 0.03125, %v4625_v9 }
0x214e   : > { %v4631_v16 = vsub.f32 %v4619_v0, %v4629_v14  ;;  %v4634_v17 = vmul.f32 %v4632_v12, %v4632_v12 }
0x2150   : > { %v4638_v18 = vsel %vm528_vm0, %v4634_v17, 0.0  ;;  %v4633_v19 = vmul.f32 %v4631_v16, %v4631_v16 }
0x2151   : > { %4639 = vadd.xlane.f32.xlu0 %v4638_v18 }
0x2152   : > { %v4635_v20 = vsel %vm528_vm0, %v4633_v19, 0.0 }
0x2153   : > { %4636 = vadd.xlane.f32.xlu1 %v4635_v20 }
0x21da   : > { %v4640_v21 = vpop.xlane.xlu0 %4639 }
0x21db   : > { %v4642_v22 = vmul.f32 0.03125, %v4640_v21 }
0x21dc   : > { %v4637_v24 = vpop.xlane.xlu1 %4636 }
0x21dd   : > { %v4644_v26 = vadd.f32 1e-05, %v4642_v22  ;;  %v4641_v6 = vmul.f32 0.03125, %v4637_v24 }
0x21df   : > { %5452 = vrsqrt.f32 %v4644_v26  ;;  %v4643_v23 = vadd.f32 1e-05, %v4641_v6 }
0x21e1   : > { %5454 = vrsqrt.f32 %v4643_v23 }
0x21ec   : > { %v5453_v27 = vpop.eup %5452 }
0x21ed   : > { %v4648_v30 = vmul.f32 %v5453_v27, %v4632_v12 }
0x21ee   : > { %v5455_v28 = vpop.eup %5454 }
0x21ef   : > { %v4656_v32 = vmul.f32 %v4886_v29, %v4648_v30  ;;  %v4647_v10 = vmul.f32 %v5455_v28, %v4631_v16 }
0x21f1   : > { %v4664_v25 = vadd.f32 %v4887_v31, %v4656_v32  ;;  %v4655_v33 = vmul.f32 %v4886_v29, %v4647_v10 }
0x21f3   : > { %v4663_v34 = vadd.f32 %v4887_v31, %v4655_v33  ;;  %4666 = vst.msk [vmem:[%s512_s16 + $0x8] sm:$0xff] %vm528_vm0, %v4664_v25 }
0x21f5   : > { %4665 = vst.msk [vmem:[%s512_s16] sm:$0xff] %vm528_vm0, %v4663_v34 }
0x21f6   : > { %5497 = shalt.err (!%p5494_p10)
}
0x21f7   : > { %s5498_s17 = scalar_lea.hbm %s6300_s28, 256  ;;  %s5502_s24 = scalar_lea.hbm %s6409_s23, 512 }
0x21f8   : > { %p5499_p0 = scmp.ne.s32.totalorder %s6300_s28, %s5498_s17  ;;  %p5503_p1 = scmp.lt.s32.totalorder %s6300_s28, %s6409_s23 }
0x21f9   : > { %p5504_p3 = scmp.lt.s32.totalorder %s5502_s24, %s5498_s17 }
0x21fa   : > { %p5500_p2 = pnand %p5499_p0, %p6410_p12 }
0x21fb   : > { %p5505_p6 = por %p5504_p3, %p5503_p1 }
0x21fc   : > { %p5501_p9 = pneg %p5500_p2 }
0x21fe   : > { %p5506_p11 = pnand %p5505_p6, %p5501_p9 }
0x2200   : > { %5509 = shalt.err (!%p5506_p11)
}
0x2201   : > { %s5567_s26 = smov 128   ;;  %s5568_s18 = smov 8  }
0x2202   : > { %5311 = dma.vmem_to_hbm [thread:$0]  (%p6410_p12), %s6302_s29, 256, %s6300_s28, %s4668_s22, %s5567_s26, %s5567_s26, %s5568_s18  }
0x2203 PF: > { %s6411_s20 = sld [smem:[#allocation8_spill]]  ;;  %p6414_p4 = scmp.ge.s32.totalorder %s5548_s21, 2 }
0x2204   : > { %s6412_s25 = sld [smem:[#allocation13_spill]] }
0x2209   : > { %s4696_s16 = sand.u32 1, %s6411_s20  }
0x220a   : > { %p6413_p13 = scmp.ne.s32.totalorder %s6412_s25, 0  ;;  %s4697_s17 = scalar_lea.sflag [#allocation4], %s4696_s16 }
0x220c   : > { %p5318_p5 = pnand %p6414_p4, %p6413_p13 }
0x220e   : > { %p5319_p7 = pneg %p5318_p5 }
0x2210   : > { %5531 = dma.done.wait (%p5319_p7), %s4697_s17, 256  }
0x2211   : > { %5533 = vsyncadd (%p5319_p7), %s4697_s17, 4294967040  ;;  %s6415_s21 = sld [smem:[#allocation10_spill]]  ;;  %s6418_s18 = smov %s5540_s19 }
0x2212   : > { %s6416_s24 = sld [smem:[#allocation9_spill]] }
0x2213   : > { %s6417_s20 = sld [smem:[#allocation11_spill]] }
0x2217   : > { %p28_p8 = scmp.ge.s32.totalorder %s6415_s21, 4  }
0x2218   : > { %s6419_s19 = smov %s6416_s24 }
0x2219   :  { %30 = sbr.rel (!%p28_p8) target bundleno = 8 (0x8), region = 143 }
0x221e   :  { %4702 = vsyncpa [#allocation3], 1 }
0x221f   :  { %4704 = vsyncpa [#allocation3 + $0x1], 1 }
0x2220   :  { %4705 = vsyncpa [#allocation4], 1 }
0x2221   :  { %4707 = vsyncpa [#allocation4 + $0x1], 1 }

</bundles_post_ra>
